<compile_context>
chip_gen: v6e
topology: v6e:2x2x1
jax: 0.10.0
libtpu: 0.0.40
codegen_flags: <defaults>
</compile_context>

<pallas_src>
import functools
import math

import jax
import jax.numpy as jnp
from jax import lax
from jax.experimental import pallas as pl
from jax.experimental.pallas import tpu as pltpu


# ----------------------------------- Pallas kernel -----------------------------------

def decoder_stack_kernel(x0_ref, src_ref,
                         wqkv1_ref, wo1_ref,
                         wq2_ref, wkv2_ref, wo2_ref,
                         w1_ref, w2_ref,
                         g1_ref, b1_ref, g2_ref, b2_ref, g3_ref, b3_ref,
                         out_ref, attn1_ref, attn2_ref,
                         x_scr,
                         *, Bb, St, Ss, H, eps, causal_self, compute_dtype):
    """One grid step = one (batch block, decoder layer) pair."""
    D = x0_ref.shape[-1]
    dk = D // H
    l = pl.program_id(1)
    n_layers = pl.num_programs(1)

    cd = compute_dtype
    use_approx_recip = jnp.dtype(cd) == jnp.dtype(jnp.bfloat16)

    # Layer 0: load the embedded target activations into the persistent scratch.
    @pl.when(l == 0)
    def _():
        x_scr[...] = x0_ref[...]

    x = x_scr[...]            # (Bb*St, D) fp32 running activation
    src = src_ref[...]        # (Bb*Ss, D) fp32 encoder output

    def layernorm(y, g, b):
        mu = jnp.mean(y, axis=-1, keepdims=True)
        var = jnp.mean((y - mu) ** 2, axis=-1, keepdims=True)   # biased, as nn.LayerNorm
        return (y - mu) * lax.rsqrt(var + eps) * g + b

    def heads(t, S):
        # (Bb*S, D) -> (Bb*H, S, dk): one head-batched operand for the MXU.
        return t.reshape(Bb, S, H, dk).transpose(0, 2, 1, 3).reshape(Bb * H, S, dk)

    def attend(q, k, v, Sq, Skv, causal):
        """Head-batched attention. 1/sqrt(dk) is pre-folded into the Q weights."""
        qh, kh, vh = heads(q, Sq), heads(k, Skv), heads(v, Skv)
        s = jnp.einsum('bqd,bkd->bqk', qh, kh,
                       preferred_element_type=jnp.float32)        # (Bb*H, Sq, Skv)
        if causal:
            row = lax.broadcasted_iota(jnp.int32, (Sq, Skv), 0)
            col = lax.broadcasted_iota(jnp.int32, (Sq, Skv), 1)
            s = jnp.where((col <= row)[None, :, :], s, jnp.float32(-1e30))
        s = s - jnp.max(s, axis=-1, keepdims=True)
        e = jnp.exp(s)
        denom = jnp.sum(e, axis=-1, keepdims=True)
        if use_approx_recip:
            p = e * pl.reciprocal(denom, approx=True)             # EUP slot
        else:
            p = e / denom                                          # exact fp32 path
        ctx = jnp.einsum('bqk,bkd->bqd', p.astype(cd), vh,
                         preferred_element_type=jnp.float32)       # (Bb*H, Sq, dk)
        ctx = ctx.reshape(Bb, H, Sq, dk).transpose(0, 2, 1, 3).reshape(Bb * Sq, D)
        return ctx, p

    # 1) masked multi-head self-attention (fused QKV projection) + residual + norm1
    xc = x.astype(cd)
    qkv = jnp.dot(xc, wqkv1_ref[...], preferred_element_type=jnp.float32)   # (Bb*St, 3D)
    q1 = qkv[:, :D].astype(cd)
    k1 = qkv[:, D:2 * D].astype(cd)
    v1 = qkv[:, 2 * D:].astype(cd)
    ctx1, p1 = attend(q1, k1, v1, St, St, causal_self)
    x = layernorm(x + jnp.dot(ctx1.astype(cd), wo1_ref[...],
                              preferred_element_type=jnp.float32),
                  g1_ref[...], b1_ref[...])

    # 2) cross-attention over the encoder output (fused KV projection) + residual + norm2
    xc = x.astype(cd)
    srcc = src.astype(cd)
    q2 = jnp.dot(xc, wq2_ref[...], preferred_element_type=jnp.float32).astype(cd)
    kv = jnp.dot(srcc, wkv2_ref[...], preferred_element_type=jnp.float32)   # (Bb*Ss, 2D)
    k2 = kv[:, :D].astype(cd)
    v2 = kv[:, D:].astype(cd)
    ctx2, p2 = attend(q2, k2, v2, St, Ss, False)
    x = layernorm(x + jnp.dot(ctx2.astype(cd), wo2_ref[...],
                              preferred_element_type=jnp.float32),
                  g2_ref[...], b2_ref[...])

    # 3) feed-forward (Linear -> ReLU -> Linear, dropout = identity) + residual + norm3
    xc = x.astype(cd)
    h = jnp.maximum(jnp.dot(xc, w1_ref[...], preferred_element_type=jnp.float32), 0.0)
    x = layernorm(x + jnp.dot(h.astype(cd), w2_ref[...],
                              preferred_element_type=jnp.float32),
                  g3_ref[...], b3_ref[...])

    # carry activation to the next layer (VMEM-resident, no HBM round trip)
    x_scr[...] = x

    # only the final layer's results ever leave VMEM
    @pl.when(l == n_layers - 1)
    def _():
        out_ref[...] = x                                     # (Bb*St, D) dense slab
        attn1_ref[...] = p1.reshape(Bb * H * St, St)
        attn2_ref[...] = p2.reshape(Bb * H * St, Ss)


# ---------------------------- one-time parameter preparation ----------------------------

def prepare_decoder_params(params, *, nhead, compute_dtype=jnp.float32):
    """Hoisted out of the forward pass: fuse QKV / KV projections, fold the
    1/sqrt(dk) attention scale into Wq, stack per-layer weights along a leading
    L axis and cast matmul weights to the MXU compute dtype."""
    D = params['emb'].shape[1]
    dk = D // nhead
    scale = 1.0 / math.sqrt(dk)
    cd = compute_dtype

    def stack(fn, dtype):
        return jnp.stack([fn(lp) for lp in params['layers']], axis=0).astype(dtype)

    return {
        'wqkv1': stack(lambda p: jnp.concatenate(
            [p['wq1'] * scale, p['wk1'], p['wv1']], axis=1), cd),      # (L, D, 3D)
        'wo1':  stack(lambda p: p['wo1'], cd),                          # (L, D, D)
        'wq2':  stack(lambda p: p['wq2'] * scale, cd),                  # (L, D, D)
        'wkv2': stack(lambda p: jnp.concatenate(
            [p['wk2'], p['wv2']], axis=1), cd),                         # (L, D, 2D)
        'wo2':  stack(lambda p: p['wo2'], cd),                          # (L, D, D)
        'w1':   stack(lambda p: p['w1'], cd),                           # (L, D, F)
        'w2':   stack(lambda p: p['w2'], cd),                           # (L, F, D)
        'g1':   stack(lambda p: p['g1'], jnp.float32),                  # (L, 1, D)
        'b1':   stack(lambda p: p['b1'], jnp.float32),
        'g2':   stack(lambda p: p['g2'], jnp.float32),
        'b2':   stack(lambda p: p['b2'], jnp.float32),
        'g3':   stack(lambda p: p['g3'], jnp.float32),
        'b3':   stack(lambda p: p['b3'], jnp.float32),
    }


# ----------------------------------- stack wrapper -----------------------------------

def decoder_stack(src, tgt, prep, *, nhead, eps=1e-5, causal_self=True,
                  compute_dtype=jnp.float32, batch_block=1):
    """All decoder layers in a single pallas_call with grid=(B/Bb, L)."""
    B, St, D = tgt.shape
    _, Ss, _ = src.shape
    H = nhead
    dk = D // H
    L = prep['wqkv1'].shape[0]
    F = prep['w1'].shape[-1]
    Bb = batch_block
    assert D % H == 0 and B % Bb == 0
    assert (Bb * St) % 8 == 0 and (Bb * Ss) % 8 == 0, "sequence block must fill sublanes"
    # NOTE: at production shapes pick St/Ss multiples of 128 so the tall output
    # slabs below are lane-dense (unmasked vst); at the demo shapes the stores
    # are lane-masked but still sublane-dense.

    x2d = tgt.reshape(B * St, D).astype(jnp.float32)
    s2d = src.reshape(B * Ss, D).astype(jnp.float32)

    kernel = functools.partial(decoder_stack_kernel, Bb=Bb, St=St, Ss=Ss, H=H,
                               eps=eps, causal_self=causal_self,
                               compute_dtype=compute_dtype)

    # activations: indexed by batch block, invariant across the layer axis
    act_spec = lambda rows: pl.BlockSpec((rows, D), lambda b, l: (b, 0))
    # stacked per-layer weights: leading L axis squeezed, indexed by the layer id
    wspec = lambda arr: pl.BlockSpec((None,) + arr.shape[1:], lambda b, l: (l, 0, 0))

    in_specs = [
        act_spec(Bb * St), act_spec(Bb * Ss),
        wspec(prep['wqkv1']), wspec(prep['wo1']),
        wspec(prep['wq2']), wspec(prep['wkv2']), wspec(prep['wo2']),
        wspec(prep['w1']), wspec(prep['w2']),
        wspec(prep['g1']), wspec(prep['b1']),
        wspec(prep['g2']), wspec(prep['b2']),
        wspec(prep['g3']), wspec(prep['b3']),
    ]
    out_specs = (
        pl.BlockSpec((Bb * St, D), lambda b, l: (b, 0)),
        pl.BlockSpec((Bb * H * St, St), lambda b, l: (b, 0)),
        pl.BlockSpec((Bb * H * St, Ss), lambda b, l: (b, 0)),
    )
    out_shape = (
        jax.ShapeDtypeStruct((B * St, D), jnp.float32),
        jax.ShapeDtypeStruct((B * H * St, St), jnp.float32),
        jax.ShapeDtypeStruct((B * H * St, Ss), jnp.float32),
    )

    # --- VMEM budget (per-layer resident footprint, double-buffered I/O) ---
    w_item = jnp.dtype(compute_dtype).itemsize
    weight_keys = ('wqkv1', 'wo1', 'wq2', 'wkv2', 'wo2', 'w1', 'w2')
    ln_keys = ('g1', 'b1', 'g2', 'b2', 'g3', 'b3')
    wbytes = (sum(int(prep[k][0].size) for k in weight_keys) * w_item
              + sum(int(prep[k][0].size) for k in ln_keys) * 4)
    io_bytes = (Bb * St * D + Bb * Ss * D                      # activation inputs
                + Bb * St * D + Bb * H * St * St + Bb * H * St * Ss) * 4   # outputs
    interm_bytes = (Bb * St * 3 * D + Bb * St * F
                    + 3 * Bb * H * St * max(St, Ss) + 4 * Bb * St * D) * 4
    vmem_limit = int(2 * (wbytes + io_bytes) + interm_bytes + (4 << 20))
    vmem_limit = max(16 << 20, min(vmem_limit, 64 << 20))

    # --- advisory cost estimate ---
    flops_per_layer = (
        2 * B * St * D * (3 * D + 3 * D)       # qkv, wo1, wq2, wo2 projections
        + 2 * B * Ss * D * (2 * D)             # cross-attn KV projection
        + 2 * B * St * D * F * 2               # FFN
        + 4 * B * H * St * St * dk             # self-attn scores + ctx
        + 4 * B * H * St * Ss * dk             # cross-attn scores + ctx
    )
    transc_per_layer = B * H * (St * St + St * Ss)
    bytes_accessed = int(
        x2d.size * 4 + s2d.size * 4
        + sum(int(prep[k].size) for k in weight_keys) * w_item
        + sum(int(prep[k].size) for k in ln_keys) * 4
        + (B * St * D + B * H * St * St + B * H * St * Ss) * 4)
    cost = pl.CostEstimate(flops=int(L * flops_per_layer),
                           transcendentals=int(L * transc_per_layer),
                           bytes_accessed=bytes_accessed)

    fn = pl.pallas_call(
        kernel,
        out_shape=out_shape,
        grid_spec=pltpu.PrefetchScalarGridSpec(
            num_scalar_prefetch=0,
            grid=(B // Bb, L),
            in_specs=in_specs,
            out_specs=out_specs,
            scratch_shapes=[pltpu.VMEM((Bb * St, D), jnp.float32)]),
        compiler_params=pltpu.CompilerParams(
            dimension_semantics=("parallel", "arbitrary"),
            vmem_limit_bytes=vmem_limit),
        cost_estimate=cost,
    )
    out_f, a1_f, a2_f = fn(x2d, s2d,
                           prep['wqkv1'], prep['wo1'],
                           prep['wq2'], prep['wkv2'], prep['wo2'],
                           prep['w1'], prep['w2'],
                           prep['g1'], prep['b1'], prep['g2'], prep['b2'],
                           prep['g3'], prep['b3'])
    return (out_f.reshape(B, St, D),
            a1_f.reshape(B, H, St, St),
            a2_f.reshape(B, H, St, Ss))


# -------------------------- embeddings / positional encoding --------------------------

def make_positional_encoding(maxlen, dm):
    pos = jnp.arange(maxlen, dtype=jnp.float32)[:, None]
    i = jnp.arange(0, dm, 2, dtype=jnp.float32)[None, :]
    angle = pos / jnp.power(10000.0, i / dm)
    pe = jnp.zeros((maxlen, dm), dtype=jnp.float32)
    pe = pe.at[:, 0::2].set(jnp.sin(angle))
    pe = pe.at[:, 1::2].set(jnp.cos(angle))
    return pe


def embed(tgt_tokens, emb_table, pe, dm):
    # Embeddings: lookup (padding row zeroed) scaled by sqrt(dm), plus sinusoidal PE.
    # TODO(synk): the data-dependent embedding gather + PE add stay in plain JAX;
    # all per-layer compute runs inside the Pallas kernel.
    x = emb_table[tgt_tokens] * jnp.sqrt(jnp.float32(dm))
    return x + pe[None, :tgt_tokens.shape[1], :]


def decoder_forward(src, tgt_tokens, params, prepared, *, nhead, eps=1e-5,
                    compute_dtype=jnp.float32):
    D = params['emb'].shape[1]
    x = embed(tgt_tokens, params['emb'], params['pe'], D)
    return decoder_stack(src, x, prepared, nhead=nhead, eps=eps, causal_self=True,
                         compute_dtype=compute_dtype)


# ---------------------------------- pure-JAX reference ----------------------------------

def _mha_ref(x, kv, wq, wk, wv, wo, nhead, causal):
    Sq, D = x.shape
    Skv = kv.shape[0]
    dk = D // nhead
    q = jnp.dot(x, wq).reshape(Sq, nhead, dk).transpose(1, 0, 2)
    k = jnp.dot(kv, wk).reshape(Skv, nhead, dk).transpose(1, 0, 2)
    v = jnp.dot(kv, wv).reshape(Skv, nhead, dk).transpose(1, 0, 2)
    s = jnp.einsum('hqd,hkd->hqk', q, k) * (1.0 / jnp.sqrt(jnp.float32(dk)))
    if causal:
        row = lax.broadcasted_iota(jnp.int32, (Sq, Skv), 0)
        col = lax.broadcasted_iota(jnp.int32, (Sq, Skv), 1)
        s = jnp.where((col <= row)[None], s, jnp.float32(-1e30))
    s = s - jnp.max(s, axis=-1, keepdims=True)
    e = jnp.exp(s)
    p = e / jnp.sum(e, axis=-1, keepdims=True)
    ctx = jnp.einsum('hqk,hkd->hqd', p, v).transpose(1, 0, 2).reshape(Sq, D)
    return jnp.dot(ctx, wo), p


def _layernorm_ref(x, g, b, eps):
    mu = jnp.mean(x, axis=-1, keepdims=True)
    var = jnp.mean((x - mu) ** 2, axis=-1, keepdims=True)
    return (x - mu) * lax.rsqrt(var + eps) * g + b


def decoder_layer_ref(src, tgt, p, *, nhead, eps=1e-5, causal_self=True):
    outs, a1s, a2s = [], [], []
    for b in range(tgt.shape[0]):
        x, s = tgt[b], src[b]
        xo, a1 = _mha_ref(x, x, p['wq1'], p['wk1'], p['wv1'], p['wo1'],
                          nhead, causal_self)
        x = _layernorm_ref(x + xo, p['g1'], p['b1'], eps)
        xo, a2 = _mha_ref(x, s, p['wq2'], p['wk2'], p['wv2'], p['wo2'],
                          nhead, False)
        x = _layernorm_ref(x + xo, p['g2'], p['b2'], eps)
        h = jnp.maximum(jnp.dot(x, p['w1']), 0.0)
        xo = jnp.dot(h, p['w2'])
        outs.append(_layernorm_ref(x + xo, p['g3'], p['b3'], eps))
        a1s.append(a1)
        a2s.append(a2)
    return jnp.stack(outs), jnp.stack(a1s), jnp.stack(a2s)


def decoder_forward_ref(src, tgt_tokens, params, *, nhead, eps=1e-5):
    D = params['emb'].shape[1]
    x = embed(tgt_tokens, params['emb'], params['pe'], D)
    attn1 = attn2 = None
    for lp in params['layers']:
        x, attn1, attn2 = decoder_layer_ref(src, x, lp, nhead=nhead, eps=eps,
                                            causal_self=True)
    return x, attn1, attn2


# ------------------------------------------ main ------------------------------------------

if __name__ == "__main__":
    B, S, D, H, F = 2, 8, 32, 4, 64     # batch, seq, d_model, nhead, dff
    L = 2                               # decoder layers (module default is 6; small demo)
    V, MAXLEN, PAD = 97, 16, 0
    eps = 1e-5

    key = jax.random.PRNGKey(0)
    kws = jax.random.split(key, 3 + 10 * L)
    init = lambda k, shape: 0.02 * jax.random.normal(k, shape, dtype=jnp.float32)

    layers = []
    for l in range(L):
        k = kws[3 + 10 * l: 3 + 10 * (l + 1)]
        layers.append({
            'wq1': init(k[0], (D, D)), 'wk1': init(k[1], (D, D)),
            'wv1': init(k[2], (D, D)), 'wo1': init(k[3], (D, D)),
            'wq2': init(k[4], (D, D)), 'wk2': init(k[5], (D, D)),
            'wv2': init(k[6], (D, D)), 'wo2': init(k[7], (D, D)),
            'w1': init(k[8], (D, F)), 'w2': init(k[9], (F, D)),
            'g1': jnp.ones((1, D), jnp.float32), 'b1': jnp.zeros((1, D), jnp.float32),
            'g2': jnp.ones((1, D), jnp.float32), 'b2': jnp.zeros((1, D), jnp.float32),
            'g3': jnp.ones((1, D), jnp.float32), 'b3': jnp.zeros((1, D), jnp.float32),
        })

    emb = init(kws[0], (V, D)).at[PAD].set(0.0)          # padding_idx row = 0
    params = {'emb': emb, 'pe': make_positional_encoding(MAXLEN, D), 'layers': layers}

    tgt_tokens = jax.random.randint(kws[1], (B, S), 0, V)
    src = jax.random.normal(kws[2], (B, S, D), dtype=jnp.float32)   # encoder output

    # --- fp32 MXU path: tight validation against the reference ---
    prep_f32 = prepare_decoder_params(params, nhead=H, compute_dtype=jnp.float32)
    out, attn1, attn2 = decoder_forward(src, tgt_tokens, params, prep_f32,
                                        nhead=H, eps=eps, compute_dtype=jnp.float32)
    jax.block_until_ready((out, attn1, attn2))

    ro, ra1, ra2 = decoder_forward_ref(src, tgt_tokens, params, nhead=H, eps=eps)
    assert out.shape == (B, S, D)
    assert attn1.shape == (B, H, S, S) and attn2.shape == (B, H, S, S)
    assert jnp.allclose(out, ro, rtol=5e-4, atol=5e-4), float(jnp.max(jnp.abs(out - ro)))
    assert jnp.allclose(attn1, ra1, rtol=5e-4, atol=5e-4)
    assert jnp.allclose(attn2, ra2, rtol=5e-4, atol=5e-4)

    # --- bf16 MXU path (review item): deliberately loosened tolerances ---
    prep_bf16 = prepare_decoder_params(params, nhead=H, compute_dtype=jnp.bfloat16)
    out16, a1_16, a2_16 = decoder_forward(src, tgt_tokens, params, prep_bf16,
                                          nhead=H, eps=eps, compute_dtype=jnp.bfloat16)
    jax.block_until_ready((out16, a1_16, a2_16))
    assert jnp.allclose(out16, ro, rtol=5e-2, atol=5e-2), float(jnp.max(jnp.abs(out16 - ro)))
    assert jnp.allclose(a1_16, ra1, rtol=5e-2, atol=2e-2)
    assert jnp.allclose(a2_16, ra2, rtol=5e-2, atol=2e-2)

    print("KERNEL_OK")
</pallas_src>

<mosaic_0001>
module attributes {stable_mosaic.version = 11 : i64} {
  func.func @decoder_stack_kernel(%arg0: i32, %arg1: i32, %arg2: memref<8x32xf32, #tpu.memory_space<vmem>>, %arg3: memref<8x32xf32, #tpu.memory_space<vmem>>, %arg4: memref<1x32x96xf32, #tpu.memory_space<vmem>>, %arg5: memref<1x32x32xf32, #tpu.memory_space<vmem>>, %arg6: memref<1x32x32xf32, #tpu.memory_space<vmem>>, %arg7: memref<1x32x64xf32, #tpu.memory_space<vmem>>, %arg8: memref<1x32x32xf32, #tpu.memory_space<vmem>>, %arg9: memref<1x32x64xf32, #tpu.memory_space<vmem>>, %arg10: memref<1x64x32xf32, #tpu.memory_space<vmem>>, %arg11: memref<1x1x32xf32, #tpu.memory_space<vmem>>, %arg12: memref<1x1x32xf32, #tpu.memory_space<vmem>>, %arg13: memref<1x1x32xf32, #tpu.memory_space<vmem>>, %arg14: memref<1x1x32xf32, #tpu.memory_space<vmem>>, %arg15: memref<1x1x32xf32, #tpu.memory_space<vmem>>, %arg16: memref<1x1x32xf32, #tpu.memory_space<vmem>>, %arg17: memref<8x32xf32, #tpu.memory_space<vmem>>, %arg18: memref<32x8xf32, #tpu.memory_space<vmem>>, %arg19: memref<32x8xf32, #tpu.memory_space<vmem>>, %arg20: memref<8x32xf32, #tpu.memory_space<vmem>>) attributes {dimension_semantics = [#tpu.dimension_semantics<parallel>, #tpu.dimension_semantics<arbitrary>], iteration_bounds = array<i64: 2, 2>, scalar_prefetch = 0 : i64, scratch_operands = 1 : i64, tpu.core_type = #tpu.core_type<tc>, window_params = [{transform_indices = @transform_0, window_bounds = array<i64: 8, 32>}, {transform_indices = @transform_1, window_bounds = array<i64: 8, 32>}, {transform_indices = @transform_2, window_bounds = array<i64: 1, 32, 96>}, {transform_indices = @transform_3, window_bounds = array<i64: 1, 32, 32>}, {transform_indices = @transform_4, window_bounds = array<i64: 1, 32, 32>}, {transform_indices = @transform_5, window_bounds = array<i64: 1, 32, 64>}, {transform_indices = @transform_6, window_bounds = array<i64: 1, 32, 32>}, {transform_indices = @transform_7, window_bounds = array<i64: 1, 32, 64>}, {transform_indices = @transform_8, window_bounds = array<i64: 1, 64, 32>}, {transform_indices = @transform_9, window_bounds = array<i64: 1, 1, 32>}, {transform_indices = @transform_10, window_bounds = array<i64: 1, 1, 32>}, {transform_indices = @transform_11, window_bounds = array<i64: 1, 1, 32>}, {transform_indices = @transform_12, window_bounds = array<i64: 1, 1, 32>}, {transform_indices = @transform_13, window_bounds = array<i64: 1, 1, 32>}, {transform_indices = @transform_14, window_bounds = array<i64: 1, 1, 32>}, {transform_indices = @transform_15, window_bounds = array<i64: 8, 32>}, {transform_indices = @transform_16, window_bounds = array<i64: 32, 8>}, {transform_indices = @transform_17, window_bounds = array<i64: 32, 8>}]} {
    %c0_i32 = arith.constant 0 : i32
    %0 = arith.cmpi eq, %arg1, %c0_i32 : i32
    %1 = arith.extui %0 : i1 to i32
    %c0_i32_0 = arith.constant 0 : i32
    %2 = arith.cmpi ne, %1, %c0_i32_0 : i32
    scf.if %2 {
      %c0_77 = arith.constant 0 : index
      %c0_78 = arith.constant 0 : index
      %172 = vector.load %arg2[%c0_77, %c0_78] : memref<8x32xf32, #tpu.memory_space<vmem>>, vector<8x32xf32>
      %c0_79 = arith.constant 0 : index
      %c0_80 = arith.constant 0 : index
      %173 = vector.load %arg20[%c0_79, %c0_80] : memref<8x32xf32, #tpu.memory_space<vmem>>, vector<8x32xf32>
      tpu.vector_store %arg20[%c0_79, %c0_80], %172 {strides = array<i32>} : memref<8x32xf32, #tpu.memory_space<vmem>>, vector<8x32xf32>,
    } else {
    }
    %c0 = arith.constant 0 : index
    %c0_1 = arith.constant 0 : index
    %3 = vector.load %arg20[%c0, %c0_1] : memref<8x32xf32, #tpu.memory_space<vmem>>, vector<8x32xf32>
    %c0_2 = arith.constant 0 : index
    %c0_3 = arith.constant 0 : index
    %4 = vector.load %arg3[%c0_2, %c0_3] : memref<8x32xf32, #tpu.memory_space<vmem>>, vector<8x32xf32>
    %c0_4 = arith.constant 0 : index
    %c0_5 = arith.constant 0 : index
    %c0_6 = arith.constant 0 : index
    %5 = vector.load %arg4[%c0_4, %c0_5, %c0_6] : memref<1x32x96xf32, #tpu.memory_space<vmem>>, vector<1x32x96xf32>
    %6 = vector.shape_cast %5 : vector<1x32x96xf32> to vector<32x96xf32>
    %cst = arith.constant dense<0.000000e+00> : vector<8x96xf32>
    %7 = tpu.matmul %3, %6, %cst {dimension_numbers = #tpu.dot_dimension_numbers<[1], [0], [0], [1], [0, 0, 1, 1], [], []>} : vector<8x32xf32>, vector<32x96xf32>, vector<8x96xf32> -> vector<8x96xf32>
    %8 = vector.extract_strided_slice %7 {offsets = [0, 0], sizes = [8, 32], strides = [1, 1]} : vector<8x96xf32> to vector<8x32xf32>
    %9 = vector.extract_strided_slice %7 {offsets = [0, 32], sizes = [8, 32], strides = [1, 1]} : vector<8x96xf32> to vector<8x32xf32>
    %10 = vector.extract_strided_slice %7 {offsets = [0, 64], sizes = [8, 32], strides = [1, 1]} : vector<8x96xf32> to vector<8x32xf32>
    %11 = vector.shape_cast %8 : vector<8x32xf32> to vector<1x8x4x8xf32>
    %12 = tpu.transpose %11, [0, 2, 1, 3] : vector<1x8x4x8xf32> -> vector<1x4x8x8xf32>
    %13 = vector.shape_cast %12 : vector<1x4x8x8xf32> to vector<4x8x8xf32>
    %14 = vector.shape_cast %9 : vector<8x32xf32> to vector<1x8x4x8xf32>
    %15 = tpu.transpose %14, [0, 2, 1, 3] : vector<1x8x4x8xf32> -> vector<1x4x8x8xf32>
    %16 = vector.shape_cast %15 : vector<1x4x8x8xf32> to vector<4x8x8xf32>
    %17 = vector.shape_cast %10 : vector<8x32xf32> to vector<1x8x4x8xf32>
    %18 = tpu.transpose %17, [0, 2, 1, 3] : vector<1x8x4x8xf32> -> vector<1x4x8x8xf32>
    %19 = vector.shape_cast %18 : vector<1x4x8x8xf32> to vector<4x8x8xf32>
    "tpu.trace_start"() <{level = 10 : i32, message = "bqd,bkd->bqk"}> : () -> ()
    %cst_7 = arith.constant dense<0.000000e+00> : vector<4x8x8xf32>
    %20 = tpu.matmul %13, %16, %cst_7 {dimension_numbers = #tpu.dot_dimension_numbers<[2], [2], [1], [1], [0, 0, 0, 1, 1, 1], [0], [0]>} : vector<4x8x8xf32>, vector<4x8x8xf32>, vector<4x8x8xf32> -> vector<4x8x8xf32>
    "tpu.trace_stop"() : () -> ()
    %21 = tpu.iota {dimensions = array<i32: 0>} : vector<8x8xi32>
    %22 = tpu.iota {dimensions = array<i32: 1>} : vector<8x8xi32>
    %23 = arith.cmpi sle, %22, %21 : vector<8x8xi32>
    %24 = vector.shape_cast %23 : vector<8x8xi1> to vector<1x8x8xi1>
    %cst_8 = arith.constant -1.000000e+30 : f32
    %25 = vector.shape_cast %24 : vector<1x8x8xi1> to vector<1x8x8xi1>
    %26 = vector.broadcast %25 : vector<1x8x8xi1> to vector<4x8x8xi1>
    %27 = vector.broadcast %cst_8 : f32 to vector<4x8x8xf32>
    %28 = arith.select %26, %20, %27 : vector<4x8x8xi1>, vector<4x8x8xf32>
    %cst_9 = arith.constant dense<0xFF800000> : vector<4x8xf32>
    %29 = vector.multi_reduction <maximumf>, %28, %cst_9 [2] : vector<4x8x8xf32> to vector<4x8xf32>
    %30 = vector.shape_cast %29 : vector<4x8xf32> to vector<4x8x1xf32>
    %31 = vector.broadcast %30 : vector<4x8x1xf32> to vector<4x8x8xf32>
    %32 = arith.subf %28, %31 : vector<4x8x8xf32>
    %33 = math.exp %32 : vector<4x8x8xf32>
    %cst_10 = arith.constant dense<0.000000e+00> : vector<4x8xf32>
    %34 = vector.multi_reduction <add>, %33, %cst_10 [2] : vector<4x8x8xf32> to vector<4x8xf32>
    %35 = vector.shape_cast %34 : vector<4x8xf32> to vector<4x8x1xf32>
    %36 = vector.broadcast %35 : vector<4x8x1xf32> to vector<4x8x8xf32>
    %37 = arith.divf %33, %36 : vector<4x8x8xf32>
    "tpu.trace_start"() <{level = 10 : i32, message = "bqk,bkd->bqd"}> : () -> ()
    %cst_11 = arith.constant dense<0.000000e+00> : vector<4x8x8xf32>
    %38 = tpu.matmul %37, %19, %cst_11 {dimension_numbers = #tpu.dot_dimension_numbers<[2], [1], [1], [2], [0, 0, 0, 1, 1, 2], [0], [0]>} : vector<4x8x8xf32>, vector<4x8x8xf32>, vector<4x8x8xf32> -> vector<4x8x8xf32>
    "tpu.trace_stop"() : () -> ()
    %39 = vector.shape_cast %38 : vector<4x8x8xf32> to vector<1x4x8x8xf32>
    %40 = tpu.transpose %39, [0, 2, 1, 3] : vector<1x4x8x8xf32> -> vector<1x8x4x8xf32>
    %41 = vector.shape_cast %40 : vector<1x8x4x8xf32> to vector<8x32xf32>
    %c0_12 = arith.constant 0 : index
    %c0_13 = arith.constant 0 : index
    %c0_14 = arith.constant 0 : index
    %42 = vector.load %arg5[%c0_12, %c0_13, %c0_14] : memref<1x32x32xf32, #tpu.memory_space<vmem>>, vector<1x32x32xf32>
    %43 = vector.shape_cast %42 : vector<1x32x32xf32> to vector<32x32xf32>
    %cst_15 = arith.constant dense<0.000000e+00> : vector<8x32xf32>
    %44 = tpu.matmul %41, %43, %cst_15 {dimension_numbers = #tpu.dot_dimension_numbers<[1], [0], [0], [1], [0, 0, 1, 1], [], []>} : vector<8x32xf32>, vector<32x32xf32>, vector<8x32xf32> -> vector<8x32xf32>
    %45 = arith.addf %3, %44 : vector<8x32xf32>
    %c0_16 = arith.constant 0 : index
    %c0_17 = arith.constant 0 : index
    %c0_18 = arith.constant 0 : index
    %46 = vector.load %arg11[%c0_16, %c0_17, %c0_18] : memref<1x1x32xf32, #tpu.memory_space<vmem>>, vector<1x1x32xf32>
    %47 = vector.shape_cast %46 : vector<1x1x32xf32> to vector<1x32xf32>
    %c0_19 = arith.constant 0 : index
    %c0_20 = arith.constant 0 : index
    %c0_21 = arith.constant 0 : index
    %48 = vector.load %arg12[%c0_19, %c0_20, %c0_21] : memref<1x1x32xf32, #tpu.memory_space<vmem>>, vector<1x1x32xf32>
    %49 = vector.shape_cast %48 : vector<1x1x32xf32> to vector<1x32xf32>
    %cst_22 = arith.constant dense<0.000000e+00> : vector<8xf32>
    %50 = vector.multi_reduction <add>, %45, %cst_22 [1] : vector<8x32xf32> to vector<8xf32>
    %51 = vector.shape_cast %50 : vector<8xf32> to vector<8x1xf32>
    %cst_23 = arith.constant 3.200000e+01 : f32
    %52 = vector.broadcast %cst_23 : f32 to vector<8x1xf32>
    %53 = arith.divf %51, %52 : vector<8x1xf32>
    %54 = vector.broadcast %53 : vector<8x1xf32> to vector<8x32xf32>
    %55 = arith.subf %45, %54 : vector<8x32xf32>
    %56 = arith.mulf %55, %55 : vector<8x32xf32>
    %cst_24 = arith.constant dense<0.000000e+00> : vector<8xf32>
    %57 = vector.multi_reduction <add>, %56, %cst_24 [1] : vector<8x32xf32> to vector<8xf32>
    %58 = vector.shape_cast %57 : vector<8xf32> to vector<8x1xf32>
    %cst_25 = arith.constant 3.200000e+01 : f32
    %59 = vector.broadcast %cst_25 : f32 to vector<8x1xf32>
    %60 = arith.divf %58, %59 : vector<8x1xf32>
    %61 = vector.broadcast %53 : vector<8x1xf32> to vector<8x32xf32>
    %62 = arith.subf %45, %61 : vector<8x32xf32>
    %cst_26 = arith.constant 9.99999974E-6 : f32
    %63 = vector.broadcast %cst_26 : f32 to vector<8x1xf32>
    %64 = arith.addf %60, %63 : vector<8x1xf32>
    %65 = math.rsqrt %64 : vector<8x1xf32>
    %66 = vector.broadcast %65 : vector<8x1xf32> to vector<8x32xf32>
    %67 = arith.mulf %62, %66 : vector<8x32xf32>
    %68 = vector.broadcast %47 : vector<1x32xf32> to vector<8x32xf32>
    %69 = arith.mulf %67, %68 : vector<8x32xf32>
    %70 = vector.broadcast %49 : vector<1x32xf32> to vector<8x32xf32>
    %71 = arith.addf %69, %70 : vector<8x32xf32>
    %c0_27 = arith.constant 0 : index
    %c0_28 = arith.constant 0 : index
    %c0_29 = arith.constant 0 : index
    %72 = vector.load %arg6[%c0_27, %c0_28, %c0_29] : memref<1x32x32xf32, #tpu.memory_space<vmem>>, vector<1x32x32xf32>
    %73 = vector.shape_cast %72 : vector<1x32x32xf32> to vector<32x32xf32>
    %cst_30 = arith.constant dense<0.000000e+00> : vector<8x32xf32>
    %74 = tpu.matmul %71, %73, %cst_30 {dimension_numbers = #tpu.dot_dimension_numbers<[1], [0], [0], [1], [0, 0, 1, 1], [], []>} : vector<8x32xf32>, vector<32x32xf32>, vector<8x32xf32> -> vector<8x32xf32>
    %c0_31 = arith.constant 0 : index
    %c0_32 = arith.constant 0 : index
    %c0_33 = arith.constant 0 : index
    %75 = vector.load %arg7[%c0_31, %c0_32, %c0_33] : memref<1x32x64xf32, #tpu.memory_space<vmem>>, vector<1x32x64xf32>
    %76 = vector.shape_cast %75 : vector<1x32x64xf32> to vector<32x64xf32>
    %cst_34 = arith.constant dense<0.000000e+00> : vector<8x64xf32>
    %77 = tpu.matmul %4, %76, %cst_34 {dimension_numbers = #tpu.dot_dimension_numbers<[1], [0], [0], [1], [0, 0, 1, 1], [], []>} : vector<8x32xf32>, vector<32x64xf32>, vector<8x64xf32> -> vector<8x64xf32>
    %78 = vector.extract_strided_slice %77 {offsets = [0, 0], sizes = [8, 32], strides = [1, 1]} : vector<8x64xf32> to vector<8x32xf32>
    %79 = vector.extract_strided_slice %77 {offsets = [0, 32], sizes = [8, 32], strides = [1, 1]} : vector<8x64xf32> to vector<8x32xf32>
    %80 = vector.shape_cast %74 : vector<8x32xf32> to vector<1x8x4x8xf32>
    %81 = tpu.transpose %80, [0, 2, 1, 3] : vector<1x8x4x8xf32> -> vector<1x4x8x8xf32>
    %82 = vector.shape_cast %81 : vector<1x4x8x8xf32> to vector<4x8x8xf32>
    %83 = vector.shape_cast %78 : vector<8x32xf32> to vector<1x8x4x8xf32>
    %84 = tpu.transpose %83, [0, 2, 1, 3] : vector<1x8x4x8xf32> -> vector<1x4x8x8xf32>
    %85 = vector.shape_cast %84 : vector<1x4x8x8xf32> to vector<4x8x8xf32>
    %86 = vector.shape_cast %79 : vector<8x32xf32> to vector<1x8x4x8xf32>
    %87 = tpu.transpose %86, [0, 2, 1, 3] : vector<1x8x4x8xf32> -> vector<1x4x8x8xf32>
    %88 = vector.shape_cast %87 : vector<1x4x8x8xf32> to vector<4x8x8xf32>
    "tpu.trace_start"() <{level = 10 : i32, message = "bqd,bkd->bqk"}> : () -> ()
    %cst_35 = arith.constant dense<0.000000e+00> : vector<4x8x8xf32>
    %89 = tpu.matmul %82, %85, %cst_35 {dimension_numbers = #tpu.dot_dimension_numbers<[2], [2], [1], [1], [0, 0, 0, 1, 1, 1], [0], [0]>} : vector<4x8x8xf32>, vector<4x8x8xf32>, vector<4x8x8xf32> -> vector<4x8x8xf32>
    "tpu.trace_stop"() : () -> ()
    %cst_36 = arith.constant dense<0xFF800000> : vector<4x8xf32>
    %90 = vector.multi_reduction <maximumf>, %89, %cst_36 [2] : vector<4x8x8xf32> to vector<4x8xf32>
    %91 = vector.shape_cast %90 : vector<4x8xf32> to vector<4x8x1xf32>
    %92 = vector.broadcast %91 : vector<4x8x1xf32> to vector<4x8x8xf32>
    %93 = arith.subf %89, %92 : vector<4x8x8xf32>
    %94 = math.exp %93 : vector<4x8x8xf32>
    %cst_37 = arith.constant dense<0.000000e+00> : vector<4x8xf32>
    %95 = vector.multi_reduction <add>, %94, %cst_37 [2] : vector<4x8x8xf32> to vector<4x8xf32>
    %96 = vector.shape_cast %95 : vector<4x8xf32> to vector<4x8x1xf32>
    %97 = vector.broadcast %96 : vector<4x8x1xf32> to vector<4x8x8xf32>
    %98 = arith.divf %94, %97 : vector<4x8x8xf32>
    "tpu.trace_start"() <{level = 10 : i32, message = "bqk,bkd->bqd"}> : () -> ()
    %cst_38 = arith.constant dense<0.000000e+00> : vector<4x8x8xf32>
    %99 = tpu.matmul %98, %88, %cst_38 {dimension_numbers = #tpu.dot_dimension_numbers<[2], [1], [1], [2], [0, 0, 0, 1, 1, 2], [0], [0]>} : vector<4x8x8xf32>, vector<4x8x8xf32>, vector<4x8x8xf32> -> vector<4x8x8xf32>
    "tpu.trace_stop"() : () -> ()
    %100 = vector.shape_cast %99 : vector<4x8x8xf32> to vector<1x4x8x8xf32>
    %101 = tpu.transpose %100, [0, 2, 1, 3] : vector<1x4x8x8xf32> -> vector<1x8x4x8xf32>
    %102 = vector.shape_cast %101 : vector<1x8x4x8xf32> to vector<8x32xf32>
    %c0_39 = arith.constant 0 : index
    %c0_40 = arith.constant 0 : index
    %c0_41 = arith.constant 0 : index
    %103 = vector.load %arg8[%c0_39, %c0_40, %c0_41] : memref<1x32x32xf32, #tpu.memory_space<vmem>>, vector<1x32x32xf32>
    %104 = vector.shape_cast %103 : vector<1x32x32xf32> to vector<32x32xf32>
    %cst_42 = arith.constant dense<0.000000e+00> : vector<8x32xf32>
    %105 = tpu.matmul %102, %104, %cst_42 {dimension_numbers = #tpu.dot_dimension_numbers<[1], [0], [0], [1], [0, 0, 1, 1], [], []>} : vector<8x32xf32>, vector<32x32xf32>, vector<8x32xf32> -> vector<8x32xf32>
    %106 = arith.addf %71, %105 : vector<8x32xf32>
    %c0_43 = arith.constant 0 : index
    %c0_44 = arith.constant 0 : index
    %c0_45 = arith.constant 0 : index
    %107 = vector.load %arg13[%c0_43, %c0_44, %c0_45] : memref<1x1x32xf32, #tpu.memory_space<vmem>>, vector<1x1x32xf32>
    %108 = vector.shape_cast %107 : vector<1x1x32xf32> to vector<1x32xf32>
    %c0_46 = arith.constant 0 : index
    %c0_47 = arith.constant 0 : index
    %c0_48 = arith.constant 0 : index
    %109 = vector.load %arg14[%c0_46, %c0_47, %c0_48] : memref<1x1x32xf32, #tpu.memory_space<vmem>>, vector<1x1x32xf32>
    %110 = vector.shape_cast %109 : vector<1x1x32xf32> to vector<1x32xf32>
    %cst_49 = arith.constant dense<0.000000e+00> : vector<8xf32>
    %111 = vector.multi_reduction <add>, %106, %cst_49 [1] : vector<8x32xf32> to vector<8xf32>
    %112 = vector.shape_cast %111 : vector<8xf32> to vector<8x1xf32>
    %cst_50 = arith.constant 3.200000e+01 : f32
    %113 = vector.broadcast %cst_50 : f32 to vector<8x1xf32>
    %114 = arith.divf %112, %113 : vector<8x1xf32>
    %115 = vector.broadcast %114 : vector<8x1xf32> to vector<8x32xf32>
    %116 = arith.subf %106, %115 : vector<8x32xf32>
    %117 = arith.mulf %116, %116 : vector<8x32xf32>
    %cst_51 = arith.constant dense<0.000000e+00> : vector<8xf32>
    %118 = vector.multi_reduction <add>, %117, %cst_51 [1] : vector<8x32xf32> to vector<8xf32>
    %119 = vector.shape_cast %118 : vector<8xf32> to vector<8x1xf32>
    %cst_52 = arith.constant 3.200000e+01 : f32
    %120 = vector.broadcast %cst_52 : f32 to vector<8x1xf32>
    %121 = arith.divf %119, %120 : vector<8x1xf32>
    %122 = vector.broadcast %114 : vector<8x1xf32> to vector<8x32xf32>
    %123 = arith.subf %106, %122 : vector<8x32xf32>
    %cst_53 = arith.constant 9.99999974E-6 : f32
    %124 = vector.broadcast %cst_53 : f32 to vector<8x1xf32>
    %125 = arith.addf %121, %124 : vector<8x1xf32>
    %126 = math.rsqrt %125 : vector<8x1xf32>
    %127 = vector.broadcast %126 : vector<8x1xf32> to vector<8x32xf32>
    %128 = arith.mulf %123, %127 : vector<8x32xf32>
    %129 = vector.broadcast %108 : vector<1x32xf32> to vector<8x32xf32>
    %130 = arith.mulf %128, %129 : vector<8x32xf32>
    %131 = vector.broadcast %110 : vector<1x32xf32> to vector<8x32xf32>
    %132 = arith.addf %130, %131 : vector<8x32xf32>
    %c0_54 = arith.constant 0 : index
    %c0_55 = arith.constant 0 : index
    %c0_56 = arith.constant 0 : index
    %133 = vector.load %arg9[%c0_54, %c0_55, %c0_56] : memref<1x32x64xf32, #tpu.memory_space<vmem>>, vector<1x32x64xf32>
    %134 = vector.shape_cast %133 : vector<1x32x64xf32> to vector<32x64xf32>
    %cst_57 = arith.constant dense<0.000000e+00> : vector<8x64xf32>
    %135 = tpu.matmul %132, %134, %cst_57 {dimension_numbers = #tpu.dot_dimension_numbers<[1], [0], [0], [1], [0, 0, 1, 1], [], []>} : vector<8x32xf32>, vector<32x64xf32>, vector<8x64xf32> -> vector<8x64xf32>
    %cst_58 = arith.constant 0.000000e+00 : f32
    %136 = vector.broadcast %cst_58 : f32 to vector<8x64xf32>
    %137 = arith.maximumf %135, %136 : vector<8x64xf32>
    %c0_59 = arith.constant 0 : index
    %c0_60 = arith.constant 0 : index
    %c0_61 = arith.constant 0 : index
    %138 = vector.load %arg10[%c0_59, %c0_60, %c0_61] : memref<1x64x32xf32, #tpu.memory_space<vmem>>, vector<1x64x32xf32>
    %139 = vector.shape_cast %138 : vector<1x64x32xf32> to vector<64x32xf32>
    %cst_62 = arith.constant dense<0.000000e+00> : vector<8x32xf32>
    %140 = tpu.matmul %137, %139, %cst_62 {dimension_numbers = #tpu.dot_dimension_numbers<[1], [0], [0], [1], [0, 0, 1, 1], [], []>} : vector<8x64xf32>, vector<64x32xf32>, vector<8x32xf32> -> vector<8x32xf32>
    %141 = arith.addf %132, %140 : vector<8x32xf32>
    %c0_63 = arith.constant 0 : index
    %c0_64 = arith.constant 0 : index
    %c0_65 = arith.constant 0 : index
    %142 = vector.load %arg15[%c0_63, %c0_64, %c0_65] : memref<1x1x32xf32, #tpu.memory_space<vmem>>, vector<1x1x32xf32>
    %143 = vector.shape_cast %142 : vector<1x1x32xf32> to vector<1x32xf32>
    %c0_66 = arith.constant 0 : index
    %c0_67 = arith.constant 0 : index
    %c0_68 = arith.constant 0 : index
    %144 = vector.load %arg16[%c0_66, %c0_67, %c0_68] : memref<1x1x32xf32, #tpu.memory_space<vmem>>, vector<1x1x32xf32>
    %145 = vector.shape_cast %144 : vector<1x1x32xf32> to vector<1x32xf32>
    %cst_69 = arith.constant dense<0.000000e+00> : vector<8xf32>
    %146 = vector.multi_reduction <add>, %141, %cst_69 [1] : vector<8x32xf32> to vector<8xf32>
    %147 = vector.shape_cast %146 : vector<8xf32> to vector<8x1xf32>
    %cst_70 = arith.constant 3.200000e+01 : f32
    %148 = vector.broadcast %cst_70 : f32 to vector<8x1xf32>
    %149 = arith.divf %147, %148 : vector<8x1xf32>
    %150 = vector.broadcast %149 : vector<8x1xf32> to vector<8x32xf32>
    %151 = arith.subf %141, %150 : vector<8x32xf32>
    %152 = arith.mulf %151, %151 : vector<8x32xf32>
    %cst_71 = arith.constant dense<0.000000e+00> : vector<8xf32>
    %153 = vector.multi_reduction <add>, %152, %cst_71 [1] : vector<8x32xf32> to vector<8xf32>
    %154 = vector.shape_cast %153 : vector<8xf32> to vector<8x1xf32>
    %cst_72 = arith.constant 3.200000e+01 : f32
    %155 = vector.broadcast %cst_72 : f32 to vector<8x1xf32>
    %156 = arith.divf %154, %155 : vector<8x1xf32>
    %157 = vector.broadcast %149 : vector<8x1xf32> to vector<8x32xf32>
    %158 = arith.subf %141, %157 : vector<8x32xf32>
    %cst_73 = arith.constant 9.99999974E-6 : f32
    %159 = vector.broadcast %cst_73 : f32 to vector<8x1xf32>
    %160 = arith.addf %156, %159 : vector<8x1xf32>
    %161 = math.rsqrt %160 : vector<8x1xf32>
    %162 = vector.broadcast %161 : vector<8x1xf32> to vector<8x32xf32>
    %163 = arith.mulf %158, %162 : vector<8x32xf32>
    %164 = vector.broadcast %143 : vector<1x32xf32> to vector<8x32xf32>
    %165 = arith.mulf %163, %164 : vector<8x32xf32>
    %166 = vector.broadcast %145 : vector<1x32xf32> to vector<8x32xf32>
    %167 = arith.addf %165, %166 : vector<8x32xf32>
    %c0_74 = arith.constant 0 : index
    %c0_75 = arith.constant 0 : index
    %168 = vector.load %arg20[%c0_74, %c0_75] : memref<8x32xf32, #tpu.memory_space<vmem>>, vector<8x32xf32>
    tpu.vector_store %arg20[%c0_74, %c0_75], %167 {strides = array<i32>} : memref<8x32xf32, #tpu.memory_space<vmem>>, vector<8x32xf32>,
    %c1_i32 = arith.constant 1 : i32
    %169 = arith.cmpi eq, %arg1, %c1_i32 : i32
    %170 = arith.extui %169 : i1 to i32
    %c0_i32_76 = arith.constant 0 : i32
    %171 = arith.cmpi ne, %170, %c0_i32_76 : i32
    scf.if %171 {
      %c0_77 = arith.constant 0 : index
      %c0_78 = arith.constant 0 : index
      %172 = vector.load %arg17[%c0_77, %c0_78] : memref<8x32xf32, #tpu.memory_space<vmem>>, vector<8x32xf32>
      tpu.vector_store %arg17[%c0_77, %c0_78], %167 {strides = array<i32>} : memref<8x32xf32, #tpu.memory_space<vmem>>, vector<8x32xf32>,
      %173 = vector.shape_cast %37 : vector<4x8x8xf32> to vector<32x8xf32>
      %c0_79 = arith.constant 0 : index
      %c0_80 = arith.constant 0 : index
      %174 = vector.load %arg18[%c0_79, %c0_80] : memref<32x8xf32, #tpu.memory_space<vmem>>, vector<32x8xf32>
      tpu.vector_store %arg18[%c0_79, %c0_80], %173 {strides = array<i32>} : memref<32x8xf32, #tpu.memory_space<vmem>>, vector<32x8xf32>,
      %175 = vector.shape_cast %98 : vector<4x8x8xf32> to vector<32x8xf32>
      %c0_81 = arith.constant 0 : index
      %c0_82 = arith.constant 0 : index
      %176 = vector.load %arg19[%c0_81, %c0_82] : memref<32x8xf32, #tpu.memory_space<vmem>>, vector<32x8xf32>
      tpu.vector_store %arg19[%c0_81, %c0_82], %175 {strides = array<i32>} : memref<32x8xf32, #tpu.memory_space<vmem>>, vector<32x8xf32>,
    } else {
    }
    return
  }
  func.func @transform_0(%arg0: i32, %arg1: i32) -> (i32, i32) {
    %c0_i32 = arith.constant 0 : i32
    %c0_i32_0 = arith.constant 0 : i32
    return %arg0, %c0_i32 : i32, i32
  }
  func.func @transform_1(%arg0: i32, %arg1: i32) -> (i32, i32) {
    %c0_i32 = arith.constant 0 : i32
    %c0_i32_0 = arith.constant 0 : i32
    return %arg0, %c0_i32 : i32, i32
  }
  func.func @transform_2(%arg0: i32, %arg1: i32) -> (i32, i32, i32) {
    %c0_i32 = arith.constant 0 : i32
    %c0_i32_0 = arith.constant 0 : i32
    %c0_i32_1 = arith.constant 0 : i32
    return %arg1, %c0_i32, %c0_i32_0 : i32, i32, i32
  }
  func.func @transform_3(%arg0: i32, %arg1: i32) -> (i32, i32, i32) {
    %c0_i32 = arith.constant 0 : i32
    %c0_i32_0 = arith.constant 0 : i32
    %c0_i32_1 = arith.constant 0 : i32
    return %arg1, %c0_i32, %c0_i32_0 : i32, i32, i32
  }
  func.func @transform_4(%arg0: i32, %arg1: i32) -> (i32, i32, i32) {
    %c0_i32 = arith.constant 0 : i32
    %c0_i32_0 = arith.constant 0 : i32
    %c0_i32_1 = arith.constant 0 : i32
    return %arg1, %c0_i32, %c0_i32_0 : i32, i32, i32
  }
  func.func @transform_5(%arg0: i32, %arg1: i32) -> (i32, i32, i32) {
    %c0_i32 = arith.constant 0 : i32
    %c0_i32_0 = arith.constant 0 : i32
    %c0_i32_1 = arith.constant 0 : i32
    return %arg1, %c0_i32, %c0_i32_0 : i32, i32, i32
  }
  func.func @transform_6(%arg0: i32, %arg1: i32) -> (i32, i32, i32) {
    %c0_i32 = arith.constant 0 : i32
    %c0_i32_0 = arith.constant 0 : i32
    %c0_i32_1 = arith.constant 0 : i32
    return %arg1, %c0_i32, %c0_i32_0 : i32, i32, i32
  }
  func.func @transform_7(%arg0: i32, %arg1: i32) -> (i32, i32, i32) {
    %c0_i32 = arith.constant 0 : i32
    %c0_i32_0 = arith.constant 0 : i32
    %c0_i32_1 = arith.constant 0 : i32
    return %arg1, %c0_i32, %c0_i32_0 : i32, i32, i32
  }
  func.func @transform_8(%arg0: i32, %arg1: i32) -> (i32, i32, i32) {
    %c0_i32 = arith.constant 0 : i32
    %c0_i32_0 = arith.constant 0 : i32
    %c0_i32_1 = arith.constant 0 : i32
    return %arg1, %c0_i32, %c0_i32_0 : i32, i32, i32
  }
  func.func @transform_9(%arg0: i32, %arg1: i32) -> (i32, i32, i32) {
    %c0_i32 = arith.constant 0 : i32
    %c0_i32_0 = arith.constant 0 : i32
    %c0_i32_1 = arith.constant 0 : i32
    return %arg1, %c0_i32, %c0_i32_0 : i32, i32, i32
  }
  func.func @transform_10(%arg0: i32, %arg1: i32) -> (i32, i32, i32) {
    %c0_i32 = arith.constant 0 : i32
    %c0_i32_0 = arith.constant 0 : i32
    %c0_i32_1 = arith.constant 0 : i32
    return %arg1, %c0_i32, %c0_i32_0 : i32, i32, i32
  }
  func.func @transform_11(%arg0: i32, %arg1: i32) -> (i32, i32, i32) {
    %c0_i32 = arith.constant 0 : i32
    %c0_i32_0 = arith.constant 0 : i32
    %c0_i32_1 = arith.constant 0 : i32
    return %arg1, %c0_i32, %c0_i32_0 : i32, i32, i32
  }
  func.func @transform_12(%arg0: i32, %arg1: i32) -> (i32, i32, i32) {
    %c0_i32 = arith.constant 0 : i32
    %c0_i32_0 = arith.constant 0 : i32
    %c0_i32_1 = arith.constant 0 : i32
    return %arg1, %c0_i32, %c0_i32_0 : i32, i32, i32
  }
  func.func @transform_13(%arg0: i32, %arg1: i32) -> (i32, i32, i32) {
    %c0_i32 = arith.constant 0 : i32
    %c0_i32_0 = arith.constant 0 : i32
    %c0_i32_1 = arith.constant 0 : i32
    return %arg1, %c0_i32, %c0_i32_0 : i32, i32, i32
  }
  func.func @transform_14(%arg0: i32, %arg1: i32) -> (i32, i32, i32) {
    %c0_i32 = arith.constant 0 : i32
    %c0_i32_0 = arith.constant 0 : i32
    %c0_i32_1 = arith.constant 0 : i32
    return %arg1, %c0_i32, %c0_i32_0 : i32, i32, i32
  }
  func.func @transform_15(%arg0: i32, %arg1: i32) -> (i32, i32) {
    %c0_i32 = arith.constant 0 : i32
    %c0_i32_0 = arith.constant 0 : i32
    return %arg0, %c0_i32 : i32, i32
  }
  func.func @transform_16(%arg0: i32, %arg1: i32) -> (i32, i32) {
    %c0_i32 = arith.constant 0 : i32
    %c0_i32_0 = arith.constant 0 : i32
    return %arg0, %c0_i32 : i32, i32
  }
  func.func @transform_17(%arg0: i32, %arg1: i32) -> (i32, i32) {
    %c0_i32 = arith.constant 0 : i32
    %c0_i32_0 = arith.constant 0 : i32
    return %arg0, %c0_i32 : i32, i32
  }
}

</mosaic_0001>

<bundles_post_ra>
// kernel: tpu_custom_call.1
= control target key start
LH: loop header
LB: loop body
LE: loop exit
PB: predicated region body
PF: predicated region fallthrough
CT: control target
= control target key end

     0   :  { %s6220_s0 = inlined_call_operand.hbm [shape: f32[16,32], index: 0, kind: input, shape index: {}]   ;;  %s6221_s1 = inlined_call_operand.hbm [shape: f32[16,32], index: 1, kind: input, shape index: {}]   ;;  %s6222_s2 = inlined_call_operand.vmem [shape: f32[2,32,96], index: 2, kind: input, shape index: {}]   ;;  %s6223_s3 = inlined_call_operand.vmem [shape: f32[2,32,32], index: 3, kind: input, shape index: {}]   ;;  %s6224_s4 = inlined_call_operand.vmem [shape: f32[2,32,32], index: 4, kind: input, shape index: {}]   ;;  %s6225_s5 = inlined_call_operand.hbm [shape: f32[2,32,64], index: 5, kind: input, shape index: {}]   ;;  %s6226_s6 = inlined_call_operand.hbm [shape: f32[2,32,32], index: 6, kind: input, shape index: {}]   ;;  %s6227_s7 = inlined_call_operand.hbm [shape: f32[2,32,64], index: 7, kind: input, shape index: {}]   ;;  %s6228_s8 = inlined_call_operand.vmem [shape: f32[2,64,32], index: 8, kind: input, shape index: {}]   ;;  %s6229_s9 = inlined_call_operand.vmem [shape: f32[2,1,32], index: 9, kind: input, shape index: {}]   ;;  %s6230_s10 = inlined_call_operand.vmem [shape: f32[2,1,32], index: 10, kind: input, shape index: {}]   ;;  %s6231_s11 = inlined_call_operand.vmem [shape: f32[2,1,32], index: 11, kind: input, shape index: {}]   ;;  %s6232_s12 = inlined_call_operand.vmem [shape: f32[2,1,32], index: 12, kind: input, shape index: {}]   ;;  %s6233_s13 = inlined_call_operand.vmem [shape: f32[2,1,32], index: 13, kind: input, shape index: {}]   ;;  %s6234_s14 = inlined_call_operand.vmem [shape: f32[2,1,32], index: 14, kind: input, shape index: {}]   ;;  %s6235_s15 = inlined_call_operand.hbm [shape: f32[16,32], index: 15, kind: output, shape index: {0}]   ;;  %s6236_s16 = inlined_call_operand.vmem [shape: f32[64,8], index: 16, kind: output, shape index: {1}]   ;;  %s6237_s17 = inlined_call_operand.vmem [shape: f32[64,8], index: 17, kind: output, shape index: {2}]  }
   0x1   :  { %6265 = sst [smem:[#allocation38_spill]] %s6220_s0 }
   0x2   :  { %6266 = sst [smem:[#allocation39_spill]] %s6221_s1 }
   0x3   :  { %6267 = sst [smem:[#allocation40_spill]] %s6222_s2 }
   0x4   :  { %6268 = sst [smem:[#allocation41_spill]] %s6223_s3 }
   0x5   :  { %6269 = sst [smem:[#allocation42_spill]] %s6224_s4 }
   0x6   :  { %6270 = sst [smem:[#allocation43_spill]] %s6225_s5 }
   0x7   :  { %6271 = sst [smem:[#allocation44_spill]] %s6226_s6 }
   0x8   :  { %6272 = sst [smem:[#allocation45_spill]] %s6227_s7 }
   0x9   :  { %6273 = sst [smem:[#allocation46_spill]] %s6228_s8 }
   0xa   :  { %6274 = sst [smem:[#allocation47_spill]] %s6229_s9 }
   0xb   :  { %6275 = sst [smem:[#allocation48_spill]] %s6230_s10 }
   0xc   :  { %6276 = sst [smem:[#allocation49_spill]] %s6231_s11 }
   0xd   :  { %6277 = sst [smem:[#allocation50_spill]] %s6232_s12 }
   0xe   :  { %6278 = sst [smem:[#allocation51_spill]] %s6233_s13 }
   0xf   :  { %6279 = sst [smem:[#allocation52_spill]] %s6234_s14 }
  0x10   :  { %6280 = sst [smem:[#allocation53_spill]] %s6235_s15 }
  0x11   :  { %6281 = sst [smem:[#allocation54_spill]] %s6236_s16 }
  0x12   :  { %6282 = sst [smem:[#allocation55_spill]] %s6237_s17 }
  0x13   :  { %23 = vsyncpa [#allocation4], 0 }
  0x14   :  { %25 = vsyncpa [#allocation4 + $0x1], 0 }
  0x15   :  { %26 = vsyncpa [#allocation7], 0 }
  0x16   :  { %28 = vsyncpa [#allocation7 + $0x1], 0 }
  0x17   :  { %29 = vsyncpa [#allocation10], 0 }
  0x18   :  { %31 = vsyncpa [#allocation10 + $0x1], 0 }
  0x19   :  { %32 = vsyncpa [#allocation5], 0 }
  0x1a   :  { %34 = vsyncpa [#allocation5 + $0x1], 0  ;;  %s5303_s24 = smov 0   ;;  %s5305_s25 = smov 0  }
  0x1b   :  { %s5307_s26 = smov 0   ;;  %s5309_s27 = smov 0  }
  0x1c   :  { %s5311_s28 = smov 0   ;;  %s5313_s29 = smov 0  }
  0x1d   :  { %s5315_s0 = smov 0   ;;  %s5317_s30 = smov 0  }
  0x1e   :  { %s5319_s18 = smov 0   ;;  %s5321_s19 = smov 0  }
  0x1f   :  { %s5323_s1 = smov 0  }
  0x20 LB: > { %6283 = sst [smem:[#allocation18_spill]] %s5155_s25  ;;  %s5359_s20 = sadd.s32 4294967295, %s5191_s1   ;;  %s5191_s1 = sphi %s5323_s1, %s40_s1   ;;  %s5187_s19 = sphi %s5321_s19, %s6370_s19   ;;  %s5183_s18 = sphi %s5319_s18, %s6369_s18   ;;  %s5179_s30 = sphi %s5317_s30, %s6368_s30   ;;  %s5175_s0 = sphi %s5315_s0, %s6367_s0   ;;  %s5171_s29 = sphi %s5313_s29, %s6366_s29   ;;  %s5167_s28 = sphi %s5311_s28, %s6365_s28   ;;  %s5163_s27 = sphi %s5309_s27, %s6364_s27   ;;  %s5159_s26 = sphi %s5307_s26, %s6363_s26   ;;  %s5155_s25 = sphi %s5305_s25, %s6362_s25   ;;  %s5151_s24 = sphi %s5303_s24, %s6361_s24  }
  0x21   : > { %6284 = sst [smem:[#allocation19_spill]] %s5159_s26  ;;  %s4408_s21 = sadd.s32 4294967294, %s5191_s1  }
  0x22   : > { %6285 = sst [smem:[#allocation20_spill]] %s5163_s27  ;;  %s49_s22 = sadd.s32 1, %s5183_s18 }
  0x23   : > { %6286 = sst [smem:[#allocation21_spill]] %s5167_s28  ;;  %s52_s23 = sadd.s32 1, %s5187_s19 }
  0x24   : > { %6287 = sst [smem:[#allocation22_spill]] %s5171_s29  ;;  %p50_p0 = scmp.ge.s32.totalorder %s49_s22, 2 }
  0x25   : > { %6288 = sst [smem:[#allocation23_spill]] %s5175_s0  ;;  %s59_s15 = sadd.s32 1, %s5171_s29 }
  0x26   : > { %6289 = sst [smem:[#allocation24_spill]] %s5179_s30  ;;  %p66_p1 = scmp.ne.s32.totalorder %s5171_s29, %s5167_s28 }
  0x27   : > { %6290 = sst [smem:[#allocation25_spill]] %s5183_s18  ;;  %p67_p2 = scmp.eq.s32.totalorder %s5191_s1, 0 }
  0x28   : > { %6291 = sst [smem:[#allocation26_spill]] %s5187_s19  ;;  %s6372_s22 = smov (%p50_p0, %s49_s22), 0 }
  0x29   : > { %6292 = sst [smem:[#allocation27_spill]] %s5191_s1  ;;  %s6374_s23 = smov (!%p50_p0, %s52_s23), %s5187_s19 }
  0x2a   : > { %6293 = sst [smem:[#allocation28_spill]] %s6372_s22  ;;  %p5376_p3 = por %p67_p2, %p66_p1 }
  0x2b   : > { %p6240_p4 = scmp.ne.s32.totalorder %s5167_s28, %s5163_s27  ;;  %p54_p5 = scmp.ge.s32.totalorder %s6374_s23, 2 }
  0x2c   : > { %p73_p6 = scmp.eq.s32.totalorder %s5359_s20, 0  ;;  %s186_s16 = ssub.s32 %s5183_s18, %s6372_s22 }
  0x2d   : > { %s189_s14 = sadd.s32 1, %s5159_s26  ;;  %s6376_s23 = smov (%p54_p5, %s6374_s23), 0 }
  0x2e   : > { %6295 = sst [smem:[#allocation29_spill]] %s6376_s23  ;;  %p5393_p7 = por %p73_p6, %p6240_p4 }
  0x2f   : > { %p187_p8 = scmp.eq.s32.totalorder %s186_s16, 0  ;;  %s56_s12 = ssub.s32 %s5187_s19, %s6376_s23 }
  0x30   : > { %p196_p9 = scmp.ne.s32.totalorder %s5159_s26, %s5155_s25  ;;  %p57_p10 = scmp.eq.s32.totalorder %s56_s12, 0 }
  0x31   : > { %p202_p11 = scmp.ne.s32.totalorder %s5155_s25, %s5151_s24  ;;  %p460_p0 = scmp.eq.s32.totalorder %s5359_s20, 3 }
  0x32   : > { %s5404_s22 = scalar_select %p187_p8, %s5159_s26, %s189_s14  }
  0x33   : > { %s5407_s11 = scalar_select %p57_p10, %s5171_s29, %s59_s15  }
  0x34   : > { %6297 = sst [smem:[#allocation30_spill]] %s5404_s22  ;;  %p5411_p12 = por %p196_p9, %p67_p2 }
  0x35   : > { %6298 = sst [smem:[#allocation31_spill]] %s5407_s11  ;;  %p5417_p13 = por %p202_p11, %p73_p6 }
  0x36   : > { %p466_p5 = scmp.eq.s32.totalorder %s4408_s21, 3  ;;  %p4777_p4 = scmp.lt.s32.totalorder %s5191_s1, 4 }
  0x37   : > { %s6300_s16 = scalar_select %p5417_p13, 1, 0 }
  0x38   : > { %p5426_p8 = por %p460_p0, %p66_p1  ;;  %p6304_p10 = scmp.ne.s32.totalorder %s5167_s28, %s5163_s27 }
  0x39   : > { %6301 = sst [smem:[#allocation32_spill]] %s6300_s16  ;;  %s6246_s15 = sand.u32 1, %s5171_s29  }
  0x3a   : > { %s6302_s12 = scalar_select %p5426_p8, 1, 0 }
  0x3b   : > { %p5433_p2 = por %p466_p5, %p6304_p10  ;;  %s6247_s24 = sshll.u32 %s5187_s19, 7 }
  0x3c   : > { %6303 = sst [smem:[#allocation33_spill]] %s6302_s12  ;;  %s5441_s23 = sshll.u32 %s6246_s15, 3 }
  0x3d   : > { %s6305_s14 = scalar_select %p5433_p2, 1, 0 }
  0x3e   : > { %p5445_p6 = pnand %p4777_p4, %p5376_p3  ;;  %s6248_s11 = sand.u32 1, %s5191_s1  }
  0x3f   : > { %6306 = sst [smem:[#allocation34_spill]] %s6305_s14  ;;  %s560_s14 = scalar_lea.vmem [#allocation6], %s5441_s23 }
  0x40   : > { %s6308_s12 = sld [smem:[#allocation39_spill]]  ;;  %s567_s8 = sshll.u32 %s560_s14, 4  ;;  %s568_s8 = int_to_ptr.vmem [resolvable:$true] %s567_s8 }
  0x41   : > { %p5458_p1 = pnand %p4777_p4, %p5411_p12  ;;  %s5464_s17 = scalar_lea.sflag [#allocation7], %s6248_s11 }
  0x42   : > { %p6251_p3 = pneg %p5445_p6  ;;  %s4932_s4 = scalar_lea.vmem %s568_s8, 128 }
  0x43   : > { %p4933_p9 = scmp.ne.s32.totalorder %s568_s8, %s4932_s4  ;;  %s5193_s27 = smov [#allocation6]  }
  0x44   : > { %s4937_s22 = sshll.u32 %s5193_s27, 4  ;;  %s4938_s22 = int_to_ptr.vmem [resolvable:$false] %s4937_s22 }
  0x45   : > { %p4935_p11 = pnand %p4933_p9, %p6251_p3  ;;  %p4940_p5 = scmp.lt.s32.totalorder %s568_s8, %s4938_s22 }
  0x46   : > { %s565_s9 = scalar_lea.hbm %s6308_s12, %s6247_s24  ;;  %s4939_s12 = scalar_lea.vmem %s4938_s22, 256 }
  0x47   : > { %p4936_p0 = pneg %p4935_p11  ;;  %p4941_p4 = scmp.lt.s32.totalorder %s4939_s12, %s4932_s4 }
  0x49   : > { %p4942_p12 = por %p4941_p4, %p4940_p5 }
  0x4b   : > { %p4943_p10 = pnand %p4942_p12, %p4936_p0 }
  0x4d   : > { %4946 = shalt.err (!%p4943_p10)
}
  0x4e   : > { %4763 = dma.hbm_to_vmem [thread:$0]  (!%p5445_p6), %s565_s9, 128, %s568_s8, %s5464_s17  }
  0x4f   : > { %p4424_p9 = scmp.ge.s32.totalorder %s5191_s1, 1  ;;  %p703_p11 = scmp.lt.s32.totalorder %s5191_s1, 5 }
  0x50   : > { %s600_s10 = sand.u32 1, %s5159_s26   ;;  %s5478_s14 = sshll.u32 %s5183_s18, 9 }
  0x51   : > { %p5480_p5 = pnand %p4424_p9, %p703_p11  ;;  %s5484_s27 = sshll.u32 %s600_s10, 5 }
  0x52   : > { %s6311_s6 = sld [smem:[#allocation44_spill]]  ;;  %s623_s11 = scalar_lea.vmem [#allocation9], %s5484_s27 }
  0x53   : > { %s630_s3 = sshll.u32 %s623_s11, 4  ;;  %s6312_s8 = sand.u32 1, %s5191_s1   ;;  %s631_s3 = int_to_ptr.vmem [resolvable:$true] %s630_s3 }
  0x54   : > { %s5493_s9 = scalar_lea.sflag [#allocation10], %s6312_s8  ;;  %p6258_p0 = pneg %p5458_p1 }
  0x55   : > { %s4960_s18 = scalar_lea.vmem %s631_s3, 512  ;;  %s5194_s10 = smov [#allocation9]  }
  0x56   : > { %p4961_p4 = scmp.ne.s32.totalorder %s631_s3, %s4960_s18  ;;  %s4965_s26 = sshll.u32 %s5194_s10, 4  ;;  %s4966_s26 = int_to_ptr.vmem [resolvable:$false] %s4965_s26 }
  0x57   : > { %s4967_s22 = scalar_lea.vmem %s4966_s26, 1024  ;;  %p4968_p9 = scmp.lt.s32.totalorder %s631_s3, %s4966_s26 }
  0x58   : > { %s629_s24 = scalar_lea.hbm %s6311_s6, %s5478_s14  ;;  %p4963_p12 = pnand %p4961_p4, %p6258_p0 }
  0x59   : > { %p4969_p11 = scmp.lt.s32.totalorder %s4967_s22, %s4960_s18 }
  0x5a   : > { %p4964_p10 = pneg %p4963_p12 }
  0x5b   : > { %p4970_p3 = por %p4969_p11, %p4968_p9 }
  0x5d   : > { %p4971_p2 = pnand %p4970_p3, %p4964_p10 }
  0x5f   : > { %4974 = shalt.err (!%p4971_p2)
}
  0x60   : > { %s5195_s11 = smov 128   ;;  %s5196_s12 = smov 8  }
  0x61   : > { %4769 = dma.hbm_to_vmem [thread:$0]  (!%p5458_p1), %s629_s24, 512, %s631_s3, %s5493_s9, %s5195_s11, %s5195_s11, %s5196_s12  }
  0x62   : > { %s6313_s8 = sshll.u32 %s5187_s19, 7  ;;  %s6314_s18 = sld [smem:[#allocation38_spill]] }
  0x63   : > { %s542_s6 = scalar_lea.vmem [#allocation3], %s5441_s23  ;;  %s6315_s2 = sand.u32 1, %s5171_s29  }
  0x64   : > { %s549_s1 = sshll.u32 %s542_s6, 4  ;;  %s539_s30 = scalar_lea.sflag [#allocation4], %s6315_s2  ;;  %s550_s1 = int_to_ptr.vmem [resolvable:$true] %s549_s1 }
  0x65   : > { %s4988_s0 = scalar_lea.vmem %s550_s1, 128  ;;  %p6316_p3 = pneg %p5445_p6 }
  0x66   : > { %p4989_p2 = scmp.ne.s32.totalorder %s550_s1, %s4988_s0  ;;  %s5197_s16 = smov [#allocation3]  }
  0x67   : > { %s4993_s25 = sshll.u32 %s5197_s16, 4  ;;  %s4994_s25 = int_to_ptr.vmem [resolvable:$false] %s4993_s25 }
  0x68   : > { %s547_s22 = scalar_lea.hbm %s6314_s18, %s6313_s8  ;;  %p4991_p4 = pnand %p4989_p2, %p6316_p3 }
  0x69   : > { %s4995_s3 = scalar_lea.vmem %s4994_s25, 256  ;;  %p4996_p10 = scmp.lt.s32.totalorder %s550_s1, %s4994_s25 }
  0x6a   : > { %p4992_p12 = pneg %p4991_p4  ;;  %p4997_p9 = scmp.lt.s32.totalorder %s4995_s3, %s4988_s0 }
  0x6c   : > { %p4998_p11 = por %p4997_p9, %p4996_p10 }
  0x6e   : > { %p4999_p0 = pnand %p4998_p11, %p4992_p12 }
  0x70   : > { %5002 = shalt.err (!%p4999_p0)
}
  0x71   : > { %4760 = dma.hbm_to_vmem [thread:$0]  (!%p5445_p6), %s547_s22, 128, %s550_s1, %s539_s30  }
  0x72   : > { %s6317_s5 = sld [smem:[#allocation43_spill]]  ;;  %s602_s24 = scalar_lea.vmem [#allocation8], %s5484_s27 }
  0x73   : > { %s609_s8 = sshll.u32 %s602_s24, 4  ;;  %p6318_p3 = pneg %p5458_p1  ;;  %s610_s8 = int_to_ptr.vmem [resolvable:$true] %s609_s8 }
  0x74   : > { %s5016_s16 = scalar_lea.vmem %s610_s8, 512  ;;  %s5198_s25 = smov [#allocation8]  }
  0x75   : > { %p5017_p2 = scmp.ne.s32.totalorder %s610_s8, %s5016_s16  ;;  %s5021_s0 = sshll.u32 %s5198_s25, 4  ;;  %s5022_s0 = int_to_ptr.vmem [resolvable:$false] %s5021_s0 }
  0x76   : > { %s5023_s21 = scalar_lea.vmem %s5022_s0, 1024  ;;  %p5024_p0 = scmp.lt.s32.totalorder %s610_s8, %s5022_s0 }
  0x77   : > { %p5019_p4 = pnand %p5017_p2, %p6318_p3  ;;  %p5025_p10 = scmp.lt.s32.totalorder %s5023_s21, %s5016_s16 }
  0x78   : > { %s608_s23 = scalar_lea.hbm %s6317_s5, %s5478_s14 }
  0x79   : > { %p5020_p12 = pneg %p5019_p4  ;;  %p5026_p6 = por %p5025_p10, %p5024_p0 }
  0x7b   : > { %p5027_p9 = pnand %p5026_p6, %p5020_p12 }
  0x7d   : > { %5030 = shalt.err (!%p5027_p9)
}
  0x7e   : > { %4766 = dma.hbm_to_vmem [thread:$0]  (!%p5458_p1), %s608_s23, 512, %s610_s8, %s5464_s17, %s5195_s11, %s5195_s11, %s5196_s12  }
  0x7f   : > { %s6319_s7 = sld [smem:[#allocation45_spill]]  ;;  %s644_s26 = scalar_lea.vmem [#allocation11], %s5484_s27 }
  0x80   : > { %s651_s18 = sshll.u32 %s644_s26, 4  ;;  %p6320_p2 = pmov %p6318_p3  ;;  %s652_s18 = int_to_ptr.vmem [resolvable:$true] %s651_s18 }
  0x81   : > { %s5044_s22 = scalar_lea.vmem %s652_s18, 512  ;;  %s5199_s3 = smov [#allocation11]  }
  0x82   : > { %p5045_p11 = scmp.ne.s32.totalorder %s652_s18, %s5044_s22  ;;  %s5049_s2 = sshll.u32 %s5199_s3, 4  ;;  %s5050_s2 = int_to_ptr.vmem [resolvable:$false] %s5049_s2 }
  0x83   : > { %s5051_s6 = scalar_lea.vmem %s5050_s2, 1024  ;;  %p5052_p12 = scmp.lt.s32.totalorder %s652_s18, %s5050_s2 }
  0x84   : > { %p5047_p3 = pnand %p5045_p11, %p6320_p2  ;;  %p5053_p0 = scmp.lt.s32.totalorder %s5051_s6, %s5044_s22 }
  0x85   : > { %s650_s10 = scalar_lea.hbm %s6319_s7, %s5478_s14 }
  0x86   : > { %p5048_p4 = pneg %p5047_p3  ;;  %p5054_p10 = por %p5053_p0, %p5052_p12 }
  0x88   : > { %p5055_p6 = pnand %p5054_p10, %p5048_p4 }
  0x8a   : > { %5058 = shalt.err (!%p5055_p6)
}
  0x8b   : > { %4772 = dma.hbm_to_vmem [thread:$0]  (!%p5458_p1), %s650_s10, 512, %s652_s18, %s5493_s9, %s5195_s11, %s5195_s11, %s5196_s12  }
  0x8c   : > { %707 = sbr.rel (%p5480_p5) target bundleno = 4427 (0x114b), region = 80 }
  0x91   : > { %s5550_s17 = sand.u32 1, %s5167_s28  }
  0x92   : > { %6321 = sst [smem:[#allocation35_spill]] %s5550_s17  ;;  %s5553_s14 = sshll.u32 %s5550_s17, 3 }
  0x93   : > { %s710_s27 = scalar_lea.sflag [#allocation4], %s5550_s17 }
  0x94   : > { %5130 = dma.done.wait (%p5393_p7), %s710_s27, 128  }
  0x95   : > { %5132 = vsyncadd (%p5393_p7), %s710_s27, 4294967168  ;;  %s718_s15 = sand.u32 1, %s5359_s20  }
  0x96   : > { %s719_s4 = scalar_lea.sflag [#allocation7], %s718_s15 }
  0x97   : > { %5134 = dma.done.wait (%p5393_p7), %s719_s4, 128  }
  0x98   : > { %5136 = vsyncadd (%p5393_p7), %s719_s4, 4294967168  ;;  %s6322_s11 = sld [smem:[#allocation18_spill]] }
  0x9e   : > { %s729_s24 = sand.u32 1, %s6322_s11  }
  0x9f   : > { %s4427_s8 = sshll.u32 %s729_s24, 5 }
  0xa0   : > { %s5568_s16 = scalar_lea.vmem [#allocation8], %s4427_s8 }
  0xa1   : > { %5138 = dma.done.wait (%p5417_p13), %s719_s4, 512  }
  0xa2   : > { %5140 = vsyncadd (%p5417_p13), %s719_s4, 4294966784  ;;  %s737_s20 = scalar_lea.sflag [#allocation10], %s718_s15  ;;  %s5574_s25 = scalar_lea.vmem [#allocation9], %s4427_s8 }
  0xa3   : > { %6324 = sst [smem:[#allocation36_spill]] %s5574_s25 }
  0xa4   : > { %5142 = dma.done.wait (%p5417_p13), %s737_s20, 1024  }
  0xa5   : > { %5144 = vsyncadd (%p5417_p13), %s737_s20, 4294966272  ;;  %s6325_s13 = sld [smem:[#allocation23_spill]]  ;;  %s5641_s4 = scalar_lea.vmem [#allocation11], %s4427_s8 }
  0xa6   : > { %s6326_s0 = sld [smem:[#allocation24_spill]] }
  0xa7   : > { %s6327_s22 = sld [smem:[#allocation40_spill]] }
  0xa8   : > { %s6328_s27 = sld [smem:[#allocation41_spill]] }
  0xa9   : > { %s6329_s12 = sld [smem:[#allocation42_spill]] }
  0xaa   : > { %s6330_s9 = sld [smem:[#allocation46_spill]] }
  0xab   : > { %p868_p7 = scmp.lt.s32.totalorder %s6325_s13, 1  ;;  %s6333_s29 = sld [smem:[#allocation48_spill]] }
  0xac   : > { %s4439_s21 = sshll.u32 %s6326_s0, 2  ;;  %s6335_s11 = sld [smem:[#allocation50_spill]] }
  0xad   : > { %p907_p1 = scmp.lt.s32.totalorder %s4439_s21, 7  ;;  %s6337_s5 = sld [smem:[#allocation52_spill]] }
  0xae   : > { %s5583_s30 = scalar_select %p868_p7, %s6325_s13, 1 }
  0xaf   : > { %s6378_s21 = smov (!%p907_p1, %s4439_s21), 7  ;;  %p4443_p13 = scmp.ne.s32.totalorder %s6325_s13, 0 }
  0xb0   : > { %s4505_s1 = sshll.u32 %s5583_s30, 5  ;;  %s4508_s10 = sshll.u32 %s5583_s30, 6 }
  0xb1   : > { %s5590_s3 = scalar_lea.vmem %s6327_s22, %s4505_s1  ;;  %s5595_s15 = scalar_lea.vmem %s6328_s27, %s4505_s1 }
  0xb2   : > { %s5600_s24 = scalar_lea.vmem %s6329_s12, %s4505_s1  ;;  %s5605_s23 = scalar_lea.vmem %s6330_s9, %s4508_s10 }
  0xb3   : > { %6331 = sst [smem:[#allocation37_spill]] %s5605_s23  ;;  %s893_s2 = scalar_lea.vmem %s6333_s29, %s5583_s30 }
  0xb4   : > { %s899_s12 = scalar_lea.vmem %s6335_s11, %s5583_s30  ;;  %s6336_s9 = sld [smem:[#allocation51_spill]] }
  0xb5   : > { %s905_s7 = scalar_lea.vmem %s6337_s5, %s5583_s30  ;;  %s4440_s26 = sshll.u32 %s6378_s21, 3 }
  0xb6   : > { %s6338_s29 = sld [smem:[#allocation54_spill]]  ;;  %s853_s1 = scalar_lea.vmem [#allocation12], %s5553_s14 }
  0xb7   : > { %s6339_s27 = sld [smem:[#allocation55_spill]]  ;;  %s6340_s23 = scalar_lea.vmem (!%p4443_p13), [#allocation3], %s5553_s14 }
  0xb9   : > { %921 = sbr.rel (%p4443_p13) target bundleno = 192 (0xc0), region = 104 }
  0xba   : > { %s902_s10 = scalar_lea.vmem %s6336_s9, %s5583_s30 }
  0xbc   : > { %s5634_s22 = scalar_lea.vmem %s6338_s29, %s4440_s26 }
  0xbd   : > { %s5639_s17 = scalar_lea.vmem %s6339_s27, %s4440_s26 }
  0xbe   : > { %v922_v0 = vld [vmem:[%s6340_s23] sm:$0xff]  ;;  %vm923_vm0 = vcmask 261120  }
  0xbf   : > { %924 = vst.msk [vmem:[#allocation2] sm:$0xff] %vm923_vm0, %v922_v0 }
  0xc0 PF: > { %v930_v1 = vld [vmem:[%s5590_s3 + $0x18] sm:$0xff]  ;;  %v5200_v2 = vmov 0.0   ;;  %v929_v3 = vld [vmem:[%s5590_s3 + $0x10] sm:$0xff]  ;;  %vm5201_vm1 = vmmov 0   ;;  %v928_v4 = vld [vmem:[%s5590_s3 + $0x8] sm:$0xff]  ;;  %vm931_vm2 = vcmask 261120   ;;  %v1020_v14 = vlaneseq }
  0xc1   : > { %4580 = vmatprep.subr.mxu1 %v5200_v2  ;;  %4588 = vmatprep.mubr.msk.f32.mxu1 %vm5201_vm1, %v5200_v2  ;;  %v927_v5 = vld [vmem:[%s5590_s3] sm:$0xff]  ;;  %s5202_s8 = smov 104   ;;  %s5203_s25 = smov 120   ;;  %v5206_v12 = vmov 1983009808   ;;  %vm1447_vm3 = vcmask 64512  }
  0xc2   : > { %4581 = vmatpush3.msra.mxu1 %v930_v1  ;;  %4601 = vmatprep.subr.mxu0 %v5200_v2  ;;  %s5204_s13 = smov 96   ;;  %s5205_s21 = smov 112   ;;  %v1018_v13 = vunpack.c.l.s4 %v5206_v12  ;;  %v5690_v16 = vshrl.u32 %v1020_v14, 7  ;;  %v5207_v17 = vmov 1934713408   ;;  %vm2248_vm5 = vcmask 130048  }
  0xc3   : > { %4582 = vmatprep.subr.mxu1 %v5200_v2  ;;  %4603 = vmatprep.mubr.msk.f32.mxu0 %vm5201_vm1, %v5200_v2  ;;  %v1050_v18 = vunpack.c.l.s4 %v5207_v17  ;;  %s5208_s3 = smov 64   ;;  %s5210_s18 = smov 8   ;;  %vm2250_vm6 = vcmask 195584   ;;  %vm3938_vm7 = vcmask 523264  }
  0xc4   : > { %4583 = vmatpush3.msra.mxu1 %v929_v3  ;;  %v1019_v15 = vunpack.c.0.s8 %v1018_v13  ;;  %s5211_s11 = smov 24   ;;  %s6341_s20 = scalar_lea.vmem [#allocation6], %s5553_s14 }
  0xc5   : > { %4584 = vmatprep.subr.mxu1 %v5200_v2  ;;  %v1051_v24 = vunpack.c.0.s8 %v1050_v18  ;;  %s6342_s9 = sld [smem:[#allocation47_spill]] }
  0xc6   : > { %4585 = vmatpush3.msra.mxu1 %v928_v4  ;;  %v5659_v6 = vld [vmem:[#allocation2] sm:$0xff]  ;;  %v5697_v21 = vsub.s32 %v1019_v15, %v5690_v16  ;;  %s6346_s29 = sld [smem:[#allocation37_spill]] }
  0xc7   : > { %4586 = vmatprep.subr.mxu1 %v5200_v2  ;;  %v5708_v29 = vsub.s32 %v1051_v24, %v5690_v16  ;;  %s6347_s27 = sld [smem:[#allocation49_spill]] }
  0xc8   : > { %4587 = vmatpush3.msra.mxu1 %v927_v5 }
  0xc9   : > { %4589 = vmatmul.mubr.msk.f32.vlgmr.msra.gmra.mxu1 %vm931_vm2, %v5659_v6  ;;  %4591 = vmatprep.subr.mxu1 %v5200_v2 }
  0xca   : > { %4593 = vmatprep.mubr.msk.f32.mxu1 %vm5201_vm1, %v5200_v2 }
  0xcb   : > { %s6343_s0 = scalar_lea.vmem %s6342_s9, %s5583_s30 }
 0x189   : > { %v5667_v7 = vpop.f32.mrf.mxu1 }
 0x18a   : > { %1012 = vrot.lane.b32.xlu1 %v5667_v7, %s5202_s8  ;;  %1006 = vrot.lane.b32.xlu0 %v5667_v7, %s5203_s25 }
 0x18b   : > { %v4590_v8 = vpop.f32.mrf.mxu1 }
 0x18e   : > { %1151 = vrot.lane.b32.xlu1 %v5667_v7, %s5204_s13  ;;  %1009 = vrot.lane.b32.xlu0 %v5667_v7, %s5205_s21 }
 0x1fc   : > { %v5677_v9 = vpop.permute.xlu0 %1006  ;;  %v5681_v10 = vpop.permute.xlu1 %1012 }
 0x1fd   : > { %1153 = vrot.lane.b32.xlu0 %v5677_v9, %s5204_s13  ;;  %v1031_v22 = vcombine.low %v5677_v9, %v5681_v10  ;;  %v1032_v23 = vcombine.high %v5677_v9, %v5681_v10 }
 0x1ff   : > { %v1039_v27 = vrot.slane %v1031_v22, %v5697_v21  ;;  %v1046_v28 = vrot.slane %v1032_v23, %v5697_v21 }
 0x200   : > { %v5683_v11 = vpop.permute.xlu0 %1009  ;;  %v1152_v30 = vpop.permute.xlu1 %1151 }
 0x201   : > { %1157 = vrot.lane.b32.xlu0 %v5681_v10, %s5204_s13  ;;  %1155 = vrot.lane.b32.xlu1 %v5683_v11, %s5204_s13  ;;  %v1015_v19 = vcombine.low %v5667_v7, %v5683_v11  ;;  %v1016_v20 = vcombine.high %v5667_v7, %v5683_v11 }
 0x203   : > { %v1023_v25 = vrot.slane %v1015_v19, %v5697_v21  ;;  %v1030_v26 = vrot.slane %v1016_v20, %v5697_v21 }
 0x205   : > { %v1047_v31 = vcombine.low %v1023_v25, %v1039_v27  ;;  %v1048_v32 = vcombine.high %v1023_v25, %v1039_v27  ;;  %v1063_v33 = vcombine.low %v1030_v26, %v1046_v28  ;;  %v1064_v34 = vcombine.high %v1030_v26, %v1046_v28 }
 0x207   : > { %v1055_v36 = vrot.slane %v1047_v31, %v5708_v29  ;;  %v1062_v37 = vrot.slane %v1048_v32, %v5708_v29  ;;  %v1071_v38 = vrot.slane %v1063_v33, %v5708_v29  ;;  %v1078_v39 = vrot.slane %v1064_v34, %v5708_v29 }
 0x209   : > { %v1083_v50 = vcombine.low %v1055_v36, %v1062_v37  ;;  %v4445_v51 = vcombine.high %v1055_v36, %v1062_v37  ;;  %v1099_v52 = vcombine.low %v1071_v38, %v1078_v39  ;;  %v4446_v53 = vcombine.high %v1071_v38, %v1078_v39 }
 0x20b   : > { %v1090_v62 = vrot.slane %v1083_v50, %v5697_v21  ;;  %v1098_v63 = vrot.slane %v4445_v51, %v5697_v21  ;;  %v1106_v0 = vrot.slane %v1099_v52, %v5697_v21  ;;  %v1114_v1 = vrot.slane %v4446_v53, %v5697_v21 }
 0x20d   : > { %v1115_v18 = vcombine.low %v1090_v62, %v1098_v63  ;;  %v1131_v19 = vcombine.low %v1106_v0, %v1114_v1  ;;  %v1116_v20 = vcombine.high %v1090_v62, %v1098_v63  ;;  %v1132_v22 = vcombine.high %v1106_v0, %v1114_v1 }
 0x20f   : > { %v1123_v32 = vrot.slane %v1115_v18, %v5708_v29  ;;  %v1139_v33 = vrot.slane %v1131_v19, %v5708_v29  ;;  %v1130_v34 = vrot.slane %v1116_v20, %v5708_v29 }
 0x211   : > { %v1147_v38 = vcombine.low %v1123_v32, %v1139_v33 }
 0x26f   : > { %v1154_v35 = vpop.permute.xlu0 %1153 }
 0x273   : > { %v1156_v40 = vpop.permute.xlu1 %1155  ;;  %v1158_v41 = vpop.permute.xlu0 %1157 }
 0x274   : > { %v1163_v42 = vcombine.low %v1152_v30, %v1156_v40  ;;  %v1164_v43 = vcombine.high %v1152_v30, %v1156_v40  ;;  %v1179_v44 = vcombine.low %v1154_v35, %v1158_v41  ;;  %v1180_v45 = vcombine.high %v1154_v35, %v1158_v41 }
 0x275   : > { %v1146_v35 = vrot.slane %v1132_v22, %v5708_v29  ;;  %v1148_v41 = vcombine.high %v1123_v32, %v1139_v33 }
 0x276   : > { %v1171_v46 = vrot.slane %v1163_v42, %v5697_v21  ;;  %v1178_v47 = vrot.slane %v1164_v43, %v5697_v21  ;;  %v1187_v48 = vrot.slane %v1179_v44, %v5697_v21  ;;  %v1194_v49 = vrot.slane %v1180_v45, %v5697_v21 }
 0x277   : > { %v1149_v39 = vcombine.low %v1130_v34, %v1146_v35  ;;  %v1150_v43 = vcombine.high %v1130_v34, %v1146_v35  ;;  %v1755_v44 = vand.u32 127, %v1020_v14 }
 0x278   : > { %v1195_v54 = vcombine.low %v1171_v46, %v1187_v48  ;;  %v1196_v55 = vcombine.high %v1171_v46, %v1187_v48  ;;  %v1211_v56 = vcombine.low %v1178_v47, %v1194_v49  ;;  %v1212_v57 = vcombine.high %v1178_v47, %v1194_v49 }
 0x279   : > { %vm1756_vm4 = vcmp.le.s32.totalorder %v1755_v44, %v5690_v16 }
 0x27a   : > { %v1203_v58 = vrot.slane %v1195_v54, %v5708_v29  ;;  %v1210_v59 = vrot.slane %v1196_v55, %v5708_v29  ;;  %v1219_v60 = vrot.slane %v1211_v56, %v5708_v29  ;;  %v1226_v61 = vrot.slane %v1212_v57, %v5708_v29 }
 0x27c   : > { %v1231_v3 = vcombine.low %v1203_v58, %v1210_v59  ;;  %v4447_v4 = vcombine.high %v1203_v58, %v1210_v59  ;;  %v1247_v5 = vcombine.low %v1219_v60, %v1226_v61  ;;  %v4448_v8 = vcombine.high %v1219_v60, %v1226_v61 }
 0x27e   : > { %v1238_v12 = vrot.slane %v1231_v3, %v5697_v21  ;;  %v1246_v13 = vrot.slane %v4447_v4, %v5697_v21  ;;  %v1254_v15 = vrot.slane %v1247_v5, %v5697_v21  ;;  %v1262_v17 = vrot.slane %v4448_v8, %v5697_v21 }
 0x280   : > { %v1263_v23 = vcombine.low %v1238_v12, %v1246_v13  ;;  %v1279_v24 = vcombine.low %v1254_v15, %v1262_v17  ;;  %v1264_v25 = vcombine.high %v1238_v12, %v1246_v13  ;;  %v1280_v26 = vcombine.high %v1254_v15, %v1262_v17 }
 0x282   : > { %v1271_v27 = vrot.slane %v1263_v23, %v5708_v29  ;;  %v1287_v28 = vrot.slane %v1279_v24, %v5708_v29  ;;  %v1278_v30 = vrot.slane %v1264_v25, %v5708_v29  ;;  %v1294_v31 = vrot.slane %v1280_v26, %v5708_v29 }
 0x284   : > { %v1295_v36 = vcombine.low %v1271_v27, %v1287_v28  ;;  %v1297_v37 = vcombine.low %v1278_v30, %v1294_v31  ;;  %v1296_v40 = vcombine.high %v1271_v27, %v1287_v28  ;;  %v1298_v42 = vcombine.high %v1278_v30, %v1294_v31 }
 0x286   : > { %4592 = vmatpush3.xpose.msk.msra.mxu1 %vm1447_vm3, %v1295_v36  ;;  %4602 = vmatpush3.xpose.msk.msra.mxu0 %vm1447_vm3, %v1297_v37 }
 0x287   : > { %4596 = vmatprep.subr.mxu1 %v5200_v2  ;;  %4611 = vmatprep.subr.mxu0 %v5200_v2 }
 0x289   : > { %4594 = vmatmul.mubr.msk.f32.vlgmr.msra.gmra.mxu1 %vm1447_vm3, %v1147_v38  ;;  %4604 = vmatmul.mubr.msk.f32.vlgmr.msra.gmra.mxu0 %vm1447_vm3, %v1149_v39 }
 0x28a   : > { %4597 = vmatpush3.xpose.msk.msra.mxu1 %vm1447_vm3, %v1296_v40  ;;  %4598 = vmatprep.mubr.msk.f32.mxu1 %vm5201_vm1, %v5200_v2 }
 0x28b   : > { %4606 = vmatprep.subr.mxu1 %v5200_v2  ;;  %4613 = vmatprep.mubr.msk.f32.mxu0 %vm5201_vm1, %v5200_v2 }
 0x28d   : > { %4599 = vmatmul.mubr.msk.f32.vlgmr.msra.gmra.mxu1 %vm1447_vm3, %v1148_v41 }
 0x28e   : > { %4607 = vmatpush3.xpose.msk.msra.mxu1 %vm1447_vm3, %v1298_v42  ;;  %4608 = vmatprep.mubr.msk.f32.mxu1 %vm5201_vm1, %v5200_v2 }
 0x28f   : > { %4616 = vmatprep.subr.mxu1 %v5200_v2 }
 0x291   : > { %4609 = vmatmul.mubr.msk.f32.vlgmr.msra.gmra.mxu1 %vm1447_vm3, %v1150_v43 }
 0x292   : > { %4618 = vmatprep.mubr.msk.f32.mxu1 %vm5201_vm1, %v5200_v2 }
 0x349   : > { %v1520_v45 = vpop.f32.mrf.mxu1  ;;  %v1672_v46 = vpop.f32.mrf.mxu0 }
 0x34a   : > { %v1759_v47 = vsel %vm1756_vm4, %v1520_v45, -1e+30  ;;  %v1761_v55 = vsel %vm1756_vm4, %v1672_v46, -1e+30 }
 0x34b   : > { %v4595_v48 = vpop.f32.mrf.mxu1  ;;  %v4605_v49 = vpop.f32.mrf.mxu0  ;;  %v1763_v50 = vsel %vm1447_vm3, %v1759_v47, -inf  ;;  %v1769_v16 = vsel %vm1447_vm3, %v1761_v55, -inf }
 0x34c   : > { %1764 = vmax.xlane.f32.xlu1 %v1763_v50 }
 0x34d   : > { %v1596_v51 = vpop.f32.mrf.mxu1 }
 0x34e   : > { %v1760_v52 = vsel %vm1756_vm4, %v1596_v51, -1e+30 }
 0x34f   : > { %v4600_v53 = vpop.f32.mrf.mxu1  ;;  %v1766_v54 = vsel %vm1447_vm3, %v1760_v52, -inf }
 0x350   : > { %1767 = vmax.xlane.f32.xlu0 %v1766_v54 }
 0x351   : > { %v1748_v56 = vpop.f32.mrf.mxu1 }
 0x352   : > { %v1762_v57 = vsel %vm1756_vm4, %v1748_v56, -1e+30 }
 0x353   : > { %v4610_v14 = vpop.f32.mrf.mxu1  ;;  %v1772_v58 = vsel %vm1447_vm3, %v1762_v57, -inf }
 0x354   : > { %1770 = vmax.xlane.f32.xlu0 %v1769_v16  ;;  %1773 = vmax.xlane.f32.xlu1 %v1772_v58 }
 0x365   : > { %1301 = vrot.lane.b32.xlu1 %v5677_v9, %s5208_s3 }
 0x36a   : > { %1299 = vrot.lane.b32.xlu0 %v5667_v7, %s5208_s3 }
 0x3d5   : > { %v1765_v59 = vpop.xlane.xlu1 %1764 }
 0x3d6   : > { %v1775_v60 = vsub.f32 %v1759_v47, %v1765_v59 }
 0x3d8   : > { %v1779_v61 = vmul.f32 1.442695, %v1775_v60 }
 0x3d9   : > { %v1768_v62 = vpop.xlane.xlu0 %1767 }
 0x3da   : > { %4881 = vpow2.f32 %v1779_v61  ;;  %v1776_v63 = vsub.f32 %v1760_v52, %v1768_v62 }
 0x3dc   : > { %v1781_v0 = vmul.f32 1.442695, %v1776_v63 }
 0x3dd   : > { %v1771_v1 = vpop.xlane.xlu0 %1770  ;;  %v1774_v3 = vpop.xlane.xlu1 %1773 }
 0x3de   : > { %4883 = vpow2.f32 %v1781_v0  ;;  %v1777_v4 = vsub.f32 %v1761_v55, %v1771_v1  ;;  %v1778_v5 = vsub.f32 %v1762_v57, %v1774_v3 }
 0x3e0   : > { %v1783_v8 = vmul.f32 1.442695, %v1777_v4  ;;  %v1785_v12 = vmul.f32 1.442695, %v1778_v5 }
 0x3e1   : > { %v1300_v22 = vpop.permute.xlu0 %1299  ;;  %v1302_v23 = vpop.permute.xlu1 %1301 }
 0x3e2   : > { %4885 = vpow2.f32 %v1783_v8 }
 0x3e3   : > { %4887 = vpow2.f32 %v1785_v12 }
 0x3e7   : > { %v5768_v9 = vpop.eup %4881 }
 0x3e8   : > { %v1787_v7 = vsel %vm1447_vm3, %v5768_v9, 0.0 }
 0x3e9   : > { %1788 = vadd.xlane.f32.xlu0 %v1787_v7 }
 0x3eb   : > { %v4884_v13 = vpop.eup %4883 }
 0x3ec   : > { %v1790_v15 = vsel %vm1447_vm3, %v4884_v13, 0.0 }
 0x3ed   : > { %1791 = vadd.xlane.f32.xlu1 %v1790_v15 }
 0x3ef   : > { %v5773_v17 = vpop.eup %4885 }
 0x3f0   : > { %v5775_v18 = vpop.eup %4887  ;;  %v1793_v19 = vsel %vm1447_vm3, %v5773_v17, 0.0 }
 0x3f1   : > { %1794 = vadd.xlane.f32.xlu0 %v1793_v19  ;;  %v1796_v20 = vsel %vm1447_vm3, %v5775_v18, 0.0 }
 0x3f2   : > { %1797 = vadd.xlane.f32.xlu1 %v1796_v20 }
 0x403   : > { %1303 = vrot.lane.b32.xlu1 %v5683_v11, %s5208_s3 }
 0x407   : > { %1305 = vrot.lane.b32.xlu0 %v5681_v10, %s5208_s3 }
 0x472   : > { %v1789_v24 = vpop.xlane.xlu0 %1788 }
 0x473   : > { %4889 = vrcp.f32 %v1789_v24 }
 0x476   : > { %v1792_v25 = vpop.xlane.xlu1 %1791 }
 0x477   : > { %4891 = vrcp.f32 %v1792_v25 }
 0x47a   : > { %v1795_v26 = vpop.xlane.xlu0 %1794 }
 0x47b   : > { %v1798_v27 = vpop.xlane.xlu1 %1797  ;;  %4893 = vrcp.f32 %v1795_v26 }
 0x47c   : > { %4895 = vrcp.f32 %v1798_v27 }
 0x47e   : > { %v1306_v28 = vpop.permute.xlu0 %1305 }
 0x47f   : > { %v1327_v30 = vcombine.low %v1302_v23, %v1306_v28  ;;  %v1328_v31 = vcombine.high %v1302_v23, %v1306_v28  ;;  %v1304_v32 = vpop.permute.xlu1 %1303 }
 0x480   : > { %v1311_v33 = vcombine.low %v1300_v22, %v1304_v32  ;;  %v1312_v34 = vcombine.high %v1300_v22, %v1304_v32  ;;  %v4890_v57 = vpop.eup %4889 }
 0x481   : > { %v1335_v35 = vrot.slane %v1327_v30, %v5697_v21  ;;  %v1342_v11 = vrot.slane %v1328_v31, %v5697_v21  ;;  %v5802_v0 = vmul.f32 %v4890_v57, %v5768_v9  ;;  %v2255_v9 = vld [vmem:[%s5595_s15 + $0x18] sm:$0xff] }
 0x482   : > { %v1319_v10 = vrot.slane %v1311_v33, %v5697_v21  ;;  %v1326_v36 = vrot.slane %v1312_v34, %v5697_v21 }
 0x484   : > { %v1343_v37 = vcombine.low %v1319_v10, %v1335_v35  ;;  %v1344_v38 = vcombine.high %v1319_v10, %v1335_v35  ;;  %v1359_v39 = vcombine.low %v1326_v36, %v1342_v11  ;;  %v1360_v40 = vcombine.high %v1326_v36, %v1342_v11  ;;  %v4892_v14 = vpop.eup %4891  ;;  %v2254_v11 = vld [vmem:[%s5595_s15 + $0x10] sm:$0xff]  ;;  %v2253_v10 = vld [vmem:[%s5595_s15 + $0x8] sm:$0xff] }
 0x485   : > { %v5804_v1 = vmul.f32 %v4892_v14, %v4884_v13 }
 0x486   : > { %v1351_v41 = vrot.slane %v1343_v37, %v5708_v29  ;;  %v1358_v42 = vrot.slane %v1344_v38, %v5708_v29  ;;  %v1367_v43 = vrot.slane %v1359_v39, %v5708_v29  ;;  %v1374_v44 = vrot.slane %v1360_v40, %v5708_v29 }
 0x488   : > { %v1379_v45 = vcombine.low %v1351_v41, %v1358_v42  ;;  %v4449_v46 = vcombine.high %v1351_v41, %v1358_v42  ;;  %v1395_v47 = vcombine.low %v1367_v43, %v1374_v44  ;;  %v4450_v48 = vcombine.high %v1367_v43, %v1374_v44  ;;  %v4894_v61 = vpop.eup %4893  ;;  %v2252_v44 = vld [vmem:[%s5595_s15] sm:$0xff]  ;;  %s5209_s15 = smov 16  }
 0x489   : > { %v4896_v3 = vpop.eup %4895  ;;  %v5813_v8 = vmul.f32 %v4894_v61, %v5773_v17 }
 0x48a   : > { %v1386_v49 = vrot.slane %v1379_v45, %v5697_v21  ;;  %v1394_v50 = vrot.slane %v4449_v46, %v5697_v21  ;;  %v1402_v51 = vrot.slane %v1395_v47, %v5697_v21  ;;  %v1410_v52 = vrot.slane %v4450_v48, %v5697_v21 }
 0x48b   : > { %v5816_v12 = vmul.f32 %v4896_v3, %v5775_v18 }
 0x48c   : > { %v1411_v53 = vcombine.low %v1386_v49, %v1394_v50  ;;  %v1427_v54 = vcombine.low %v1402_v51, %v1410_v52  ;;  %v1412_v55 = vcombine.high %v1386_v49, %v1394_v50  ;;  %v1428_v56 = vcombine.high %v1402_v51, %v1410_v52 }
 0x48e   : > { %v1419_v16 = vrot.slane %v1411_v53, %v5708_v29  ;;  %v1435_v58 = vrot.slane %v1427_v54, %v5708_v29  ;;  %v1426_v59 = vrot.slane %v1412_v55, %v5708_v29  ;;  %v1442_v60 = vrot.slane %v1428_v56, %v5708_v29 }
 0x490   : > { %v1443_v62 = vcombine.low %v1419_v16, %v1435_v58  ;;  %v1444_v63 = vcombine.high %v1419_v16, %v1435_v58  ;;  %v1445_v4 = vcombine.low %v1426_v59, %v1442_v60  ;;  %v1446_v5 = vcombine.high %v1426_v59, %v1442_v60 }
 0x492   : > { %4612 = vmatpush3.msra.mxu0 %v1443_v62  ;;  %4617 = vmatpush3.msra.mxu1 %v1444_v63 }
 0x493   : > { %4614 = vmatmul.mubr.msk.f32.vlgmr.msra.gmra.mxu0 %vm1447_vm3, %v5802_v0  ;;  %4619 = vmatmul.mubr.msk.f32.vlgmr.msra.gmra.mxu1 %vm1447_vm3, %v5804_v1 }
 0x494   : > { %4621 = vmatprep.subr.mxu0 %v5200_v2  ;;  %4626 = vmatprep.subr.mxu1 %v5200_v2 }
 0x495   : > { %4622 = vmatpush3.msra.mxu0 %v1445_v4  ;;  %4627 = vmatpush3.msra.mxu1 %v1446_v5 }
 0x496   : > { %4623 = vmatprep.mubr.msk.f32.mxu0 %vm5201_vm1, %v5200_v2  ;;  %4628 = vmatprep.mubr.msk.f32.mxu1 %vm5201_vm1, %v5200_v2 }
 0x497   : > { %4624 = vmatmul.mubr.msk.f32.vlgmr.msra.gmra.mxu0 %vm1447_vm3, %v5813_v8  ;;  %4629 = vmatmul.mubr.msk.f32.vlgmr.msra.gmra.mxu1 %vm1447_vm3, %v5816_v12 }
 0x498   : > { %4631 = vmatprep.subr.mxu0 %v5200_v2  ;;  %4639 = vmatprep.mubr.msk.f32.mxu0 %vm5201_vm1, %v5200_v2 }
 0x499   : > { %4642 = vmatprep.subr.mxu1 %v5200_v2  ;;  %4650 = vmatprep.mubr.msk.f32.mxu1 %vm5201_vm1, %v5200_v2 }
 0x49a   : > { %4632 = vmatpush3.msra.mxu0 %v2255_v9 }
 0x49b   : > { %4633 = vmatprep.subr.mxu0 %v5200_v2 }
 0x49c   : > { %4634 = vmatpush3.msra.mxu0 %v2254_v11  ;;  %v4466_v11 = vld [vmem:[%s6343_s0] ss:$0 sm:$0xff] }
 0x49d   : > { %4635 = vmatprep.subr.mxu0 %v5200_v2 }
 0x49e   : > { %4636 = vmatpush3.msra.mxu0 %v2253_v10 }
 0x49f   : > { %4637 = vmatprep.subr.mxu0 %v5200_v2 }
 0x4a0   : > { %4638 = vmatpush3.msra.mxu0 %v2252_v44 }
 0x4a1   : > { %4653 = vmatprep.subr.mxu0 %v5200_v2 }
 0x553   : > { %v1876_v7 = vpop.f32.mrf.mxu0  ;;  %v1949_v13 = vpop.f32.mrf.mxu1 }
 0x555   : > { %v4615_v15 = vpop.f32.mrf.mxu0  ;;  %v4620_v17 = vpop.f32.mrf.mxu1 }
 0x556   : > { %v2439_v15 = vld [vmem:[%s5568_s16 + $0x10] sm:$0xff]  ;;  %v2438_v17 = vld [vmem:[%s5568_s16 + $0x8] sm:$0xff] }
 0x557   : > { %v2022_v18 = vpop.f32.mrf.mxu0  ;;  %v2095_v19 = vpop.f32.mrf.mxu1 }
 0x558   : > { %v2099_v20 = vcombine.low %v1876_v7, %v2022_v18  ;;  %v2100_v22 = vcombine.high %v1876_v7, %v2022_v18  ;;  %v2115_v23 = vcombine.low %v1949_v13, %v2095_v19  ;;  %v2116_v24 = vcombine.high %v1949_v13, %v2095_v19  ;;  %v2440_v13 = vld [vmem:[%s5568_s16 + $0x18] sm:$0xff]  ;;  %v2437_v18 = vld [vmem:[%s5568_s16] sm:$0xff] }
 0x559   : > { %v4625_v25 = vpop.f32.mrf.mxu0  ;;  %v4630_v26 = vpop.f32.mrf.mxu1  ;;  %v926_v19 = vld [vmem:[%s6341_s20] sm:$0xff] }
 0x55a   : > { %v2107_v27 = vrot.slane %v2099_v20, %v5697_v21  ;;  %v2114_v28 = vrot.slane %v2100_v22, %v5697_v21  ;;  %v2123_v30 = vrot.slane %v2115_v23, %v5697_v21  ;;  %v2130_v31 = vrot.slane %v2116_v24, %v5697_v21  ;;  %v2363_v25 = vld [vmem:[%s5600_s24 + $0x18] sm:$0xff]  ;;  %v2362_v26 = vld [vmem:[%s5600_s24 + $0x10] sm:$0xff] }
 0x55b   : > { %4643 = vmatpush3.msra.mxu1 %v2363_v25 }
 0x55c   : > { %v2131_v32 = vcombine.low %v2107_v27, %v2123_v30  ;;  %v2132_v33 = vcombine.high %v2107_v27, %v2123_v30  ;;  %v2147_v34 = vcombine.low %v2114_v28, %v2130_v31  ;;  %v2148_v35 = vcombine.high %v2114_v28, %v2130_v31  ;;  %4644 = vmatprep.subr.mxu1 %v5200_v2  ;;  %v2361_v27 = vld [vmem:[%s5600_s24 + $0x8] sm:$0xff]  ;;  %v2360_v28 = vld [vmem:[%s5600_s24] sm:$0xff] }
 0x55d   : > { %4645 = vmatpush3.msra.mxu1 %v2362_v26 }
 0x55e   : > { %v2139_v36 = vrot.slane %v2131_v32, %v5708_v29  ;;  %v2146_v37 = vrot.slane %v2132_v33, %v5708_v29  ;;  %v2155_v38 = vrot.slane %v2147_v34, %v5708_v29  ;;  %v2162_v39 = vrot.slane %v2148_v35, %v5708_v29  ;;  %4646 = vmatprep.subr.mxu1 %v5200_v2 }
 0x55f   : > { %4647 = vmatpush3.msra.mxu1 %v2361_v27 }
 0x560   : > { %v2167_v40 = vcombine.low %v2139_v36, %v2146_v37  ;;  %v4463_v41 = vcombine.high %v2139_v36, %v2146_v37  ;;  %v2183_v42 = vcombine.low %v2155_v38, %v2162_v39  ;;  %v4464_v43 = vcombine.high %v2155_v38, %v2162_v39  ;;  %4648 = vmatprep.subr.mxu1 %v5200_v2  ;;  %v4467_v36 = vld [vmem:[%s893_s2] ss:$0 sm:$0xff]  ;;  %s6345_s2 = sld [smem:[#allocation36_spill]] }
 0x561   : > { %4649 = vmatpush3.msra.mxu1 %v2360_v28 }
 0x562   : > { %v2174_v45 = vrot.slane %v2167_v40, %v5697_v21  ;;  %v2182_v46 = vrot.slane %v4463_v41, %v5697_v21  ;;  %v2190_v47 = vrot.slane %v2183_v42, %v5697_v21  ;;  %v2198_v48 = vrot.slane %v4464_v43, %v5697_v21  ;;  %4664 = vmatprep.subr.mxu1 %v5200_v2 }
 0x564   : > { %v2200_v49 = vcombine.high %v2174_v45, %v2182_v46  ;;  %v2216_v50 = vcombine.high %v2190_v47, %v2198_v48  ;;  %v2199_v51 = vcombine.low %v2174_v45, %v2182_v46  ;;  %v2215_v52 = vcombine.low %v2190_v47, %v2198_v48 }
 0x566   : > { %v2214_v53 = vrot.slane %v2200_v49, %v5708_v29  ;;  %v2230_v54 = vrot.slane %v2216_v50, %v5708_v29  ;;  %v2207_v55 = vrot.slane %v2199_v51, %v5708_v29  ;;  %v2223_v56 = vrot.slane %v2215_v52, %v5708_v29 }
 0x568   : > { %v2233_v57 = vcombine.low %v2214_v53, %v2230_v54  ;;  %v2232_v14 = vcombine.high %v2207_v55, %v2223_v56  ;;  %v2231_v16 = vcombine.low %v2207_v55, %v2223_v56  ;;  %v2234_v58 = vcombine.high %v2214_v53, %v2230_v54 }
 0x56a   : > { %2240 = vrot.lane.b32.xlu0 %v2233_v57, %s5209_s15  ;;  %2236 = vrot.lane.b32.xlu1 %v2232_v14, %s5210_s18 }
 0x56e   : > { %2244 = vrot.lane.b32.xlu1 %v2234_v58, %s5211_s11 }
 0x5dc   : > { %v2237_v59 = vpop.permute.xlu1 %2236  ;;  %v2241_v60 = vpop.permute.xlu0 %2240 }
 0x5dd   : > { %v2247_v61 = vsel %vm1447_vm3, %v2231_v16, %v2237_v59 }
 0x5de   : > { %v2249_v63 = vsel %vm2248_vm5, %v2247_v61, %v2241_v60 }
 0x5e0   : > { %v2245_v62 = vpop.permute.xlu1 %2244 }
 0x5e1   : > { %v2251_v3 = vsel %vm2250_vm6, %v2249_v63, %v2245_v62 }
 0x5e2   : > { %4640 = vmatmul.mubr.msk.f32.vlgmr.msra.gmra.mxu0 %vm931_vm2, %v2251_v3 }
 0x5e3   : > { %4661 = vmatprep.mubr.msk.f32.mxu0 %vm5201_vm1, %v5200_v2  ;;  %4654 = vmatpush3.msra.mxu0 %v2440_v13 }
 0x5e4   : > { %4655 = vmatprep.subr.mxu0 %v5200_v2 }
 0x5e5   : > { %4656 = vmatpush3.msra.mxu0 %v2439_v15 }
 0x5e6   : > { %4657 = vmatprep.subr.mxu0 %v5200_v2 }
 0x5e7   : > { %4658 = vmatpush3.msra.mxu0 %v2438_v17 }
 0x5e8   : > { %4659 = vmatprep.subr.mxu0 %v5200_v2 }
 0x5e9   : > { %4660 = vmatpush3.msra.mxu0 %v2437_v18 }
 0x5ea   : > { %4662 = vmatmul.mubr.msk.f32.vlgmr.msra.gmra.mxu0 %vm931_vm2, %v926_v19  ;;  %4674 = vmatprep.subr.mxu0 %v5200_v2 }
 0x5eb   : > { %4676 = vmatprep.mubr.msk.f32.mxu0 %vm5201_vm1, %v5200_v2 }
 0x6a2   : > { %v2325_v4 = vpop.f32.mrf.mxu0 }
 0x6a3   : > { %v2329_v5 = vadd.f32 %v2325_v4, %v5659_v6 }
 0x6a4   : > { %v4641_v9 = vpop.f32.mrf.mxu0 }
 0x6a5   : > { %v2332_v7 = vsel %vm931_vm2, %v2329_v5, 0.0 }
 0x6a6   : > { %2333 = vadd.xlane.f32.xlu0 %v2332_v7 }
 0x6aa   : > { %v5889_v30 = vpop.f32.mrf.mxu0 }
 0x6ac   : > { %v4663_v31 = vpop.f32.mrf.mxu0 }
 0x6bc   : > { %2661 = vrot.lane.b32.xlu0 %v5889_v30, %s5203_s25 }
 0x6c0   : > { %2667 = vrot.lane.b32.xlu0 %v5889_v30, %s5202_s8 }
 0x72f   : > { %v2334_v6 = vpop.xlane.xlu0 %2333 }
 0x730   : > { %v2336_v20 = vmul.f32 0.03125, %v2334_v6 }
 0x732   : > { %v2337_v22 = vsub.f32 %v2329_v5, %v2336_v20 }
 0x733   : > { %v5913_v39 = vpop.permute.xlu0 %2661 }
 0x734   : > { %v2338_v23 = vmul.f32 %v2337_v22, %v2337_v22 }
 0x736   : > { %v2339_v24 = vsel %vm931_vm2, %v2338_v23, 0.0 }
 0x737   : > { %2340 = vadd.xlane.f32.xlu1 %v2339_v24  ;;  %v5917_v41 = vpop.permute.xlu0 %2667 }
 0x738   : > { %v2686_v44 = vcombine.low %v5913_v39, %v5917_v41  ;;  %v2687_v45 = vcombine.high %v5913_v39, %v5917_v41 }
 0x73a   : > { %v2694_v48 = vrot.slane %v2686_v44, %v5697_v21  ;;  %v2701_v49 = vrot.slane %v2687_v45, %v5697_v21 }
 0x748   : > { %2664 = vrot.lane.b32.xlu1 %v5889_v30, %s5205_s21 }
 0x7c0   : > { %v2341_v32 = vpop.xlane.xlu1 %2340 }
 0x7c1   : > { %v2342_v33 = vmul.f32 0.03125, %v2341_v32 }
 0x7c3   : > { %v2343_v34 = vadd.f32 1e-05, %v2342_v33 }
 0x7c4   : > { %v5915_v40 = vpop.permute.xlu1 %2664 }
 0x7c5   : > { %4897 = vrsqrt.f32 %v2343_v34  ;;  %v2670_v42 = vcombine.low %v5889_v30, %v5915_v40  ;;  %v2671_v43 = vcombine.high %v5889_v30, %v5915_v40 }
 0x7c7   : > { %v2678_v46 = vrot.slane %v2670_v42, %v5697_v21  ;;  %v2685_v47 = vrot.slane %v2671_v43, %v5697_v21 }
 0x7c9   : > { %v2702_v50 = vcombine.low %v2678_v46, %v2694_v48  ;;  %v2703_v51 = vcombine.high %v2678_v46, %v2694_v48  ;;  %v2718_v52 = vcombine.low %v2685_v47, %v2701_v49  ;;  %v2719_v53 = vcombine.high %v2685_v47, %v2701_v49 }
 0x7cb   : > { %v2710_v54 = vrot.slane %v2702_v50, %v5708_v29  ;;  %v2717_v55 = vrot.slane %v2703_v51, %v5708_v29  ;;  %v2726_v56 = vrot.slane %v2718_v52, %v5708_v29  ;;  %v2733_v57 = vrot.slane %v2719_v53, %v5708_v29 }
 0x7cd   : > { %v2738_v14 = vcombine.low %v2710_v54, %v2717_v55  ;;  %v4472_v16 = vcombine.high %v2710_v54, %v2717_v55  ;;  %v2754_v58 = vcombine.low %v2726_v56, %v2733_v57  ;;  %v4473_v59 = vcombine.high %v2726_v56, %v2733_v57 }
 0x7cf   : > { %v2745_v60 = vrot.slane %v2738_v14, %v5697_v21  ;;  %v2753_v61 = vrot.slane %v4472_v16, %v5697_v21  ;;  %v2761_v62 = vrot.slane %v2754_v58, %v5697_v21  ;;  %v2769_v63 = vrot.slane %v4473_v59, %v5697_v21 }
 0x7d1   : > { %v2770_v3 = vcombine.low %v2745_v60, %v2753_v61  ;;  %v2771_v4 = vcombine.high %v2745_v60, %v2753_v61  ;;  %v2786_v5 = vcombine.low %v2761_v62, %v2769_v63  ;;  %v2787_v9 = vcombine.high %v2761_v62, %v2769_v63 }
 0x7d2   : > { %v4898_v35 = vpop.eup %4897 }
 0x7d3   : > { %v2345_v10 = vmul.f32 %v4898_v35, %v2337_v22  ;;  %v2778_v7 = vrot.slane %v2770_v3, %v5708_v29  ;;  %v2794_v13 = vrot.slane %v2786_v5, %v5708_v29  ;;  %v2785_v15 = vrot.slane %v2771_v4, %v5708_v29 }
 0x7d4   : > { %v2801_v17 = vrot.slane %v2787_v9, %v5708_v29 }
 0x7d5   : > { %v2352_v37 = vmul.f32 %v4466_v11, %v2345_v10  ;;  %v2802_v18 = vcombine.low %v2778_v7, %v2794_v13  ;;  %v2803_v6 = vcombine.high %v2778_v7, %v2794_v13 }
 0x7d6   : > { %v2804_v19 = vcombine.low %v2785_v15, %v2801_v17  ;;  %v2805_v20 = vcombine.high %v2785_v15, %v2801_v17 }
 0x7d7   : > { %v5907_v38 = vadd.f32 %v4467_v36, %v2352_v37 }
 0x7d8   : > { %4675 = vmatpush3.xpose.msk.msra.mxu0 %vm1447_vm3, %v2804_v19 }
 0x7d9   : > { %4651 = vmatmul.mubr.msk.f32.vlgmr.msra.gmra.mxu1 %vm931_vm2, %v5907_v38  ;;  %4684 = vmatprep.subr.mxu0 %v5200_v2 }
 0x7da   : > { %4666 = vmatprep.mubr.msk.f32.mxu1 %vm5201_vm1, %v5200_v2  ;;  %4665 = vmatpush3.xpose.msk.msra.mxu1 %vm1447_vm3, %v2802_v18 }
 0x7db   : > { %4669 = vmatprep.subr.mxu1 %v5200_v2 }
 0x899   : > { %v2433_v22 = vpop.f32.mrf.mxu1 }
 0x89a   : > { %2518 = vrot.lane.b32.xlu0 %v2433_v22, %s5205_s21  ;;  %2515 = vrot.lane.b32.xlu1 %v2433_v22, %s5203_s25 }
 0x89b   : > { %v4652_v23 = vpop.f32.mrf.mxu1 }
 0x89e   : > { %2521 = vrot.lane.b32.xlu1 %v2433_v22, %s5202_s8 }
 0x90c   : > { %v2519_v24 = vpop.permute.xlu0 %2518  ;;  %v2516_v25 = vpop.permute.xlu1 %2515 }
 0x90d   : > { %v2524_v26 = vcombine.low %v2433_v22, %v2519_v24  ;;  %v2525_v27 = vcombine.high %v2433_v22, %v2519_v24 }
 0x90f   : > { %v2532_v33 = vrot.slane %v2524_v26, %v5697_v21  ;;  %v2539_v34 = vrot.slane %v2525_v27, %v5697_v21 }
 0x910   : > { %v2522_v28 = vpop.permute.xlu1 %2521 }
 0x911   : > { %v2540_v31 = vcombine.low %v2516_v25, %v2522_v28  ;;  %v2541_v32 = vcombine.high %v2516_v25, %v2522_v28 }
 0x913   : > { %v2548_v35 = vrot.slane %v2540_v31, %v5697_v21  ;;  %v2555_v11 = vrot.slane %v2541_v32, %v5697_v21 }
 0x915   : > { %v2556_v10 = vcombine.low %v2532_v33, %v2548_v35  ;;  %v2557_v36 = vcombine.high %v2532_v33, %v2548_v35  ;;  %v2572_v37 = vcombine.low %v2539_v34, %v2555_v11  ;;  %v2573_v42 = vcombine.high %v2539_v34, %v2555_v11 }
 0x917   : > { %v2564_v43 = vrot.slane %v2556_v10, %v5708_v29  ;;  %v2571_v44 = vrot.slane %v2557_v36, %v5708_v29  ;;  %v2580_v45 = vrot.slane %v2572_v37, %v5708_v29  ;;  %v2587_v46 = vrot.slane %v2573_v42, %v5708_v29 }
 0x919   : > { %v2592_v47 = vcombine.low %v2564_v43, %v2571_v44  ;;  %v4470_v48 = vcombine.high %v2564_v43, %v2571_v44  ;;  %v2608_v49 = vcombine.low %v2580_v45, %v2587_v46  ;;  %v4471_v50 = vcombine.high %v2580_v45, %v2587_v46 }
 0x91b   : > { %v2599_v51 = vrot.slane %v2592_v47, %v5697_v21  ;;  %v2607_v52 = vrot.slane %v4470_v48, %v5697_v21  ;;  %v2615_v53 = vrot.slane %v2608_v49, %v5697_v21  ;;  %v2623_v54 = vrot.slane %v4471_v50, %v5697_v21 }
 0x91d   : > { %v2624_v55 = vcombine.low %v2599_v51, %v2607_v52  ;;  %v2625_v56 = vcombine.high %v2599_v51, %v2607_v52  ;;  %v2640_v57 = vcombine.low %v2615_v53, %v2623_v54  ;;  %v2641_v14 = vcombine.high %v2615_v53, %v2623_v54 }
 0x91f   : > { %v2632_v16 = vrot.slane %v2624_v55, %v5708_v29  ;;  %v2648_v58 = vrot.slane %v2640_v57, %v5708_v29  ;;  %v2639_v59 = vrot.slane %v2625_v56, %v5708_v29  ;;  %v2655_v60 = vrot.slane %v2641_v14, %v5708_v29 }
 0x921   : > { %v2656_v61 = vcombine.low %v2632_v16, %v2648_v58  ;;  %v2658_v62 = vcombine.low %v2639_v59, %v2655_v60  ;;  %v2657_v63 = vcombine.high %v2632_v16, %v2648_v58  ;;  %v2659_v3 = vcombine.high %v2639_v59, %v2655_v60 }
 0x923   : > { %4667 = vmatmul.mubr.msk.f32.vlgmr.msra.gmra.mxu1 %vm1447_vm3, %v2656_v61  ;;  %4677 = vmatmul.mubr.msk.f32.vlgmr.msra.gmra.mxu0 %vm1447_vm3, %v2658_v62 }
 0x924   : > { %4670 = vmatpush3.xpose.msk.msra.mxu1 %vm1447_vm3, %v2803_v6  ;;  %4671 = vmatprep.mubr.msk.f32.mxu1 %vm5201_vm1, %v5200_v2 }
 0x925   : > { %4679 = vmatprep.subr.mxu1 %v5200_v2  ;;  %4686 = vmatprep.mubr.msk.f32.mxu0 %vm5201_vm1, %v5200_v2 }
 0x927   : > { %4672 = vmatmul.mubr.msk.f32.vlgmr.msra.gmra.mxu1 %vm1447_vm3, %v2657_v63 }
 0x928   : > { %4680 = vmatpush3.xpose.msk.msra.mxu1 %vm1447_vm3, %v2805_v20  ;;  %4681 = vmatprep.mubr.msk.f32.mxu1 %vm5201_vm1, %v5200_v2 }
 0x929   : > { %4689 = vmatprep.subr.mxu1 %v5200_v2 }
 0x92b   : > { %4682 = vmatmul.mubr.msk.f32.vlgmr.msra.gmra.mxu1 %vm1447_vm3, %v2659_v3 }
 0x92c   : > { %4691 = vmatprep.mubr.msk.f32.mxu1 %vm5201_vm1, %v5200_v2 }
 0x9e3   : > { %v3026_v4 = vpop.f32.mrf.mxu1  ;;  %v3178_v5 = vpop.f32.mrf.mxu0 }
 0x9e4   : > { %v3258_v9 = vsel %vm1447_vm3, %v3026_v4, -inf  ;;  %v3264_v17 = vsel %vm1447_vm3, %v3178_v5, -inf }
 0x9e5   : > { %v4678_v7 = vpop.f32.mrf.mxu0  ;;  %3259 = vmax.xlane.f32.xlu0 %v3258_v9  ;;  %v4668_v13 = vpop.f32.mrf.mxu1 }
 0x9e7   : > { %v3102_v15 = vpop.f32.mrf.mxu1 }
 0x9e8   : > { %v3261_v18 = vsel %vm1447_vm3, %v3102_v15, -inf }
 0x9e9   : > { %3265 = vmax.xlane.f32.xlu0 %v3264_v17  ;;  %3262 = vmax.xlane.f32.xlu1 %v3261_v18  ;;  %v4673_v19 = vpop.f32.mrf.mxu1 }
 0x9eb   : > { %v3254_v6 = vpop.f32.mrf.mxu1 }
 0x9ec   : > { %v3267_v20 = vsel %vm1447_vm3, %v3254_v6, -inf }
 0x9ed   : > { %3268 = vmax.xlane.f32.xlu0 %v3267_v20  ;;  %v4683_v22 = vpop.f32.mrf.mxu1 }
 0x9fa   : > { %2806 = vrot.lane.b32.xlu1 %v5889_v30, %s5204_s13 }
 0xa6e   : > { %v3260_v23 = vpop.xlane.xlu0 %3259 }
 0xa6f   : > { %v3270_v24 = vsub.f32 %v3026_v4, %v3260_v23 }
 0xa71   : > { %v3274_v25 = vmul.f32 1.442695, %v3270_v24 }
 0xa72   : > { %v3266_v26 = vpop.xlane.xlu0 %3265  ;;  %v3263_v27 = vpop.xlane.xlu1 %3262 }
 0xa73   : > { %4899 = vpow2.f32 %v3274_v25  ;;  %v3272_v28 = vsub.f32 %v3178_v5, %v3266_v26  ;;  %v3271_v31 = vsub.f32 %v3102_v15, %v3263_v27 }
 0xa75   : > { %v3278_v32 = vmul.f32 1.442695, %v3272_v28  ;;  %v3276_v33 = vmul.f32 1.442695, %v3271_v31 }
 0xa76   : > { %v3269_v34 = vpop.xlane.xlu0 %3268  ;;  %v2807_v46 = vpop.permute.xlu1 %2806 }
 0xa77   : > { %4901 = vpow2.f32 %v3278_v32  ;;  %v3273_v35 = vsub.f32 %v3254_v6, %v3269_v34 }
 0xa78   : > { %4903 = vpow2.f32 %v3276_v33 }
 0xa79   : > { %v3280_v11 = vmul.f32 1.442695, %v3273_v35 }
 0xa7b   : > { %4905 = vpow2.f32 %v3280_v11 }
 0xa80   : > { %v5988_v10 = vpop.eup %4899 }
 0xa81   : > { %v3282_v30 = vsel %vm1447_vm3, %v5988_v10, 0.0 }
 0xa82   : > { %3283 = vadd.xlane.f32.xlu1 %v3282_v30 }
 0xa84   : > { %v5992_v36 = vpop.eup %4901 }
 0xa85   : > { %v4904_v37 = vpop.eup %4903  ;;  %v3288_v42 = vsel %vm1447_vm3, %v5992_v36, 0.0 }
 0xa86   : > { %3289 = vadd.xlane.f32.xlu1 %v3288_v42  ;;  %v3285_v43 = vsel %vm1447_vm3, %v4904_v37, 0.0 }
 0xa87   : > { %3286 = vadd.xlane.f32.xlu0 %v3285_v43 }
 0xa88   : > { %v5997_v44 = vpop.eup %4905 }
 0xa89   : > { %v3291_v45 = vsel %vm1447_vm3, %v5997_v44, 0.0 }
 0xa8b   : > { %3292 = vadd.xlane.f32.xlu0 %v3291_v45 }
 0xa97   : > { %2810 = vrot.lane.b32.xlu1 %v5915_v40, %s5204_s13 }
 0xa9b   : > { %2812 = vrot.lane.b32.xlu1 %v5917_v41, %s5204_s13 }
 0xaa1   : > { %2808 = vrot.lane.b32.xlu0 %v5913_v39, %s5204_s13 }
 0xb0b   : > { %v3284_v47 = vpop.xlane.xlu1 %3283 }
 0xb0c   : > { %4907 = vrcp.f32 %v3284_v47 }
 0xb0f   : > { %v3290_v48 = vpop.xlane.xlu1 %3289 }
 0xb10   : > { %v3287_v49 = vpop.xlane.xlu0 %3286 }
 0xb11   : > { %4909 = vrcp.f32 %v3287_v49 }
 0xb12   : > { %4911 = vrcp.f32 %v3290_v48 }
 0xb13   : > { %v2811_v50 = vpop.permute.xlu1 %2810 }
 0xb14   : > { %v3293_v51 = vpop.xlane.xlu0 %3292  ;;  %v2818_v52 = vcombine.low %v2807_v46, %v2811_v50  ;;  %v2819_v53 = vcombine.high %v2807_v46, %v2811_v50 }
 0xb15   : > { %4913 = vrcp.f32 %v3293_v51 }
 0xb16   : > { %v2826_v40 = vrot.slane %v2818_v52, %v5697_v21  ;;  %v2833_v41 = vrot.slane %v2819_v53, %v5697_v21 }
 0xb17   : > { %v2813_v54 = vpop.permute.xlu1 %2812 }
 0xb18   : > { %v2809_v55 = vpop.permute.xlu0 %2808 }
 0xb19   : > { %v2834_v56 = vcombine.low %v2809_v55, %v2813_v54  ;;  %v2835_v57 = vcombine.high %v2809_v55, %v2813_v54  ;;  %v4908_v23 = vpop.eup %4907 }
 0xb1a   : > { %v6024_v34 = vmul.f32 %v4908_v23, %v5988_v10 }
 0xb1b   : > { %v2842_v39 = vrot.slane %v2834_v56, %v5697_v21  ;;  %v2849_v14 = vrot.slane %v2835_v57, %v5697_v21 }
 0xb1d   : > { %v2850_v16 = vcombine.low %v2826_v40, %v2842_v39  ;;  %v2851_v58 = vcombine.high %v2826_v40, %v2842_v39  ;;  %v2866_v59 = vcombine.low %v2833_v41, %v2849_v14  ;;  %v2867_v60 = vcombine.high %v2833_v41, %v2849_v14 }
 0xb1e   : > { %v4910_v24 = vpop.eup %4909 }
 0xb1f   : > { %v2858_v61 = vrot.slane %v2850_v16, %v5708_v29  ;;  %v2865_v62 = vrot.slane %v2851_v58, %v5708_v29  ;;  %v2874_v63 = vrot.slane %v2866_v59, %v5708_v29  ;;  %v2881_v3 = vrot.slane %v2867_v60, %v5708_v29  ;;  %v4912_v31 = vpop.eup %4911  ;;  %v3747_v58 = vld [vmem:[%s6345_s2 + $0x10] sm:$0xff]  ;;  %v3746_v59 = vld [vmem:[%s6345_s2 + $0x8] sm:$0xff] }
 0xb20   : > { %v6026_v35 = vmul.f32 %v4910_v24, %v4904_v37  ;;  %v6035_v10 = vmul.f32 %v4912_v31, %v5992_v36  ;;  %v3748_v36 = vld [vmem:[%s6345_s2 + $0x18] sm:$0xff] }
 0xb21   : > { %v2886_v4 = vcombine.low %v2858_v61, %v2865_v62  ;;  %v4474_v5 = vcombine.high %v2858_v61, %v2865_v62  ;;  %v2902_v9 = vcombine.low %v2874_v63, %v2881_v3  ;;  %v4475_v7 = vcombine.high %v2874_v63, %v2881_v3 }
 0xb22   : > { %v4914_v11 = vpop.eup %4913 }
 0xb23   : > { %v2893_v13 = vrot.slane %v2886_v4, %v5697_v21  ;;  %v2901_v15 = vrot.slane %v4474_v5, %v5697_v21  ;;  %v2909_v17 = vrot.slane %v2902_v9, %v5697_v21  ;;  %v2917_v18 = vrot.slane %v4475_v7, %v5697_v21  ;;  %v3745_v7 = vld [vmem:[%s6345_s2] sm:$0xff] }
 0xb24   : > { %v6038_v37 = vmul.f32 %v4914_v11, %v5997_v44 }
 0xb25   : > { %v2918_v19 = vcombine.low %v2893_v13, %v2901_v15  ;;  %v2934_v6 = vcombine.low %v2909_v17, %v2917_v18  ;;  %v2919_v20 = vcombine.high %v2893_v13, %v2901_v15  ;;  %v2935_v22 = vcombine.high %v2909_v17, %v2917_v18 }
 0xb27   : > { %v2926_v25 = vrot.slane %v2918_v19, %v5708_v29  ;;  %v2942_v26 = vrot.slane %v2934_v6, %v5708_v29  ;;  %v2933_v27 = vrot.slane %v2919_v20, %v5708_v29  ;;  %v2949_v28 = vrot.slane %v2935_v22, %v5708_v29 }
 0xb29   : > { %v2950_v32 = vcombine.low %v2926_v25, %v2942_v26  ;;  %v2951_v33 = vcombine.high %v2926_v25, %v2942_v26  ;;  %v2952_v30 = vcombine.low %v2933_v27, %v2949_v28  ;;  %v2953_v42 = vcombine.high %v2933_v27, %v2949_v28 }
 0xb2b   : > { %4685 = vmatpush3.msra.mxu0 %v2950_v32  ;;  %4690 = vmatpush3.msra.mxu1 %v2951_v33 }
 0xb2c   : > { %4687 = vmatmul.mubr.msk.f32.vlgmr.msra.gmra.mxu0 %vm1447_vm3, %v6024_v34  ;;  %4692 = vmatmul.mubr.msk.f32.vlgmr.msra.gmra.mxu1 %vm1447_vm3, %v6026_v35 }
 0xb2d   : > { %4694 = vmatprep.subr.mxu0 %v5200_v2  ;;  %4699 = vmatprep.subr.mxu1 %v5200_v2 }
 0xb2e   : > { %4695 = vmatpush3.msra.mxu0 %v2952_v30  ;;  %4700 = vmatpush3.msra.mxu1 %v2953_v42 }
 0xb2f   : > { %4696 = vmatprep.mubr.msk.f32.mxu0 %vm5201_vm1, %v5200_v2  ;;  %4701 = vmatprep.mubr.msk.f32.mxu1 %vm5201_vm1, %v5200_v2 }
 0xb30   : > { %4697 = vmatmul.mubr.msk.f32.vlgmr.msra.gmra.mxu0 %vm1447_vm3, %v6035_v10  ;;  %4702 = vmatmul.mubr.msk.f32.vlgmr.msra.gmra.mxu1 %vm1447_vm3, %v6038_v37 }
 0xb31   : > { %4704 = vmatprep.subr.mxu0 %v5200_v2  ;;  %4712 = vmatprep.mubr.msk.f32.mxu0 %vm5201_vm1, %v5200_v2 }
 0xb32   : > { %4715 = vmatprep.subr.mxu1 %v5200_v2  ;;  %4723 = vmatprep.mubr.msk.f32.mxu1 %vm5201_vm1, %v5200_v2 }
 0xb33   : > { %4705 = vmatpush3.msra.mxu0 %v3748_v36 }
 0xb34   : > { %4706 = vmatprep.subr.mxu0 %v5200_v2 }
 0xb35   : > { %4707 = vmatpush3.msra.mxu0 %v3747_v58 }
 0xb36   : > { %4708 = vmatprep.subr.mxu0 %v5200_v2 }
 0xb37   : > { %4709 = vmatpush3.msra.mxu0 %v3746_v59 }
 0xb38   : > { %4710 = vmatprep.subr.mxu0 %v5200_v2 }
 0xb39   : > { %4711 = vmatpush3.msra.mxu0 %v3745_v7 }
 0xb3a   : > { %4726 = vmatprep.subr.mxu0 %v5200_v2 }
 0xbec   : > { %v3371_v43 = vpop.f32.mrf.mxu0  ;;  %v3444_v44 = vpop.f32.mrf.mxu1 }
 0xbee   : > { %v4688_v45 = vpop.f32.mrf.mxu0  ;;  %v4693_v46 = vpop.f32.mrf.mxu1 }
 0xbf0   : > { %v3517_v47 = vpop.f32.mrf.mxu0  ;;  %v3590_v48 = vpop.f32.mrf.mxu1 }
 0xbf1   : > { %v3594_v49 = vcombine.low %v3371_v43, %v3517_v47  ;;  %v3595_v50 = vcombine.high %v3371_v43, %v3517_v47  ;;  %v3610_v51 = vcombine.low %v3444_v44, %v3590_v48  ;;  %v3611_v52 = vcombine.high %v3444_v44, %v3590_v48 }
 0xbf2   : > { %v4698_v53 = vpop.f32.mrf.mxu0  ;;  %v4703_v54 = vpop.f32.mrf.mxu1 }
 0xbf3   : > { %v3602_v55 = vrot.slane %v3594_v49, %v5697_v21  ;;  %v3609_v56 = vrot.slane %v3595_v50, %v5697_v21  ;;  %v3618_v57 = vrot.slane %v3610_v51, %v5697_v21  ;;  %v3625_v40 = vrot.slane %v3611_v52, %v5697_v21  ;;  %v3855_v51 = vld [vmem:[%s5641_s4 + $0x18] sm:$0xff]  ;;  %v3854_v52 = vld [vmem:[%s5641_s4 + $0x10] sm:$0xff]  ;;  %v3852_v53 = vld [vmem:[%s5641_s4] sm:$0xff] }
 0xbf4   : > { %4716 = vmatpush3.msra.mxu1 %v3855_v51  ;;  %v3937_v54 = vld [vmem:[%s6346_s29 + $0x38] sm:$0xff] }
 0xbf5   : > { %v3626_v41 = vcombine.low %v3602_v55, %v3618_v57  ;;  %v3627_v39 = vcombine.high %v3602_v55, %v3618_v57  ;;  %v3642_v14 = vcombine.low %v3609_v56, %v3625_v40  ;;  %v3643_v16 = vcombine.high %v3609_v56, %v3625_v40  ;;  %4717 = vmatprep.subr.mxu1 %v5200_v2  ;;  %v3936_v55 = vld [vmem:[%s6346_s29 + $0x30] sm:$0xff]  ;;  %v3935_v56 = vld [vmem:[%s6346_s29 + $0x28] sm:$0xff]  ;;  %v3934_v57 = vld [vmem:[%s6346_s29 + $0x20] sm:$0xff] }
 0xbf6   : > { %4718 = vmatpush3.msra.mxu1 %v3854_v52  ;;  %v3933_v40 = vld [vmem:[%s6346_s29 + $0x18] sm:$0xff] }
 0xbf7   : > { %v3634_v60 = vrot.slane %v3626_v41, %v5708_v29  ;;  %v3641_v61 = vrot.slane %v3627_v39, %v5708_v29  ;;  %v3650_v62 = vrot.slane %v3642_v14, %v5708_v29  ;;  %v3657_v63 = vrot.slane %v3643_v16, %v5708_v29  ;;  %4719 = vmatprep.subr.mxu1 %v5200_v2  ;;  %v3932_v41 = vld [vmem:[%s6346_s29 + $0x10] sm:$0xff] }
 0xbf9   : > { %v3662_v3 = vcombine.low %v3634_v60, %v3641_v61  ;;  %v4488_v4 = vcombine.high %v3634_v60, %v3641_v61  ;;  %v3678_v5 = vcombine.low %v3650_v62, %v3657_v63  ;;  %v4489_v9 = vcombine.high %v3650_v62, %v3657_v63  ;;  %v4492_v61 = vld [vmem:[%s899_s12] ss:$0 sm:$0xff] }
 0xbfb   : > { %v3669_v13 = vrot.slane %v3662_v3, %v5697_v21  ;;  %v3677_v15 = vrot.slane %v4488_v4, %v5697_v21  ;;  %v3685_v17 = vrot.slane %v3678_v5, %v5697_v21  ;;  %v3693_v18 = vrot.slane %v4489_v9, %v5697_v21  ;;  %v3931_v3 = vld [vmem:[%s6346_s29 + $0x8] sm:$0xff]  ;;  %v3930_v4 = vld [vmem:[%s6346_s29] sm:$0xff] }
 0xbfd   : > { %v3695_v19 = vcombine.high %v3669_v13, %v3677_v15  ;;  %v3711_v6 = vcombine.high %v3685_v17, %v3693_v18  ;;  %v3694_v20 = vcombine.low %v3669_v13, %v3677_v15  ;;  %v3710_v22 = vcombine.low %v3685_v17, %v3693_v18 }
 0xbff   : > { %v3709_v23 = vrot.slane %v3695_v19, %v5708_v29  ;;  %v3725_v24 = vrot.slane %v3711_v6, %v5708_v29  ;;  %v3702_v25 = vrot.slane %v3694_v20, %v5708_v29  ;;  %v3718_v26 = vrot.slane %v3710_v22, %v5708_v29 }
 0xc01   : > { %v3728_v27 = vcombine.low %v3709_v23, %v3725_v24  ;;  %v3727_v28 = vcombine.high %v3702_v25, %v3718_v26  ;;  %v3726_v31 = vcombine.low %v3702_v25, %v3718_v26  ;;  %v3729_v21 = vcombine.high %v3709_v23, %v3725_v24 }
 0xc03   : > { %3735 = vrot.lane.b32.xlu1 %v3728_v27, %s5209_s15  ;;  %3731 = vrot.lane.b32.xlu0 %v3727_v28, %s5210_s18  ;;  %v4495_v27 = vld [vmem:[%s902_s10] ss:$0 sm:$0xff] }
 0xc07   : > { %3739 = vrot.lane.b32.xlu0 %v3729_v21, %s5211_s11  ;;  %s6352_s11 = sld [smem:[#allocation23_spill]] }
 0xc0d   : > { %p4497_p5 = scmp.ne.s32.totalorder %s6352_s11, 1 }
 0xc75   : > { %v3732_v32 = vpop.permute.xlu0 %3731  ;;  %v3736_v33 = vpop.permute.xlu1 %3735 }
 0xc76   : > { %v3742_v11 = vsel %vm1447_vm3, %v3726_v31, %v3732_v32  ;;  %v4496_v31 = vld [vmem:[%s905_s7] ss:$0 sm:$0xff] }
 0xc77   : > { %v3743_v42 = vsel %vm2248_vm5, %v3742_v11, %v3736_v33 }
 0xc79   : > { %v3740_v30 = vpop.permute.xlu0 %3739 }
 0xc7a   : > { %v3744_v29 = vsel %vm2250_vm6, %v3743_v42, %v3740_v30 }
 0xc7b   : > { %4713 = vmatmul.mubr.msk.f32.vlgmr.msra.gmra.mxu0 %vm931_vm2, %v3744_v29 }
 0xc7c   : > { %4742 = vmatprep.mubr.msk.f32.mxu0 %vm5201_vm1, %v5200_v2  ;;  %4727 = vmatpush3.msra.mxu0 %v3937_v54 }
 0xc7d   : > { %4728 = vmatprep.subr.mxu0 %v5200_v2 }
 0xc7e   : > { %4729 = vmatpush3.msra.mxu0 %v3936_v55 }
 0xc7f   : > { %4730 = vmatprep.subr.mxu0 %v5200_v2 }
 0xc80   : > { %4731 = vmatpush3.msra.mxu0 %v3935_v56 }
 0xc81   : > { %4732 = vmatprep.subr.mxu0 %v5200_v2 }
 0xc82   : > { %4733 = vmatpush3.msra.mxu0 %v3934_v57 }
 0xc83   : > { %4734 = vmatprep.subr.mxu0 %v5200_v2 }
 0xc84   : > { %4735 = vmatpush3.msra.mxu0 %v3933_v40 }
 0xc85   : > { %4736 = vmatprep.subr.mxu0 %v5200_v2 }
 0xc86   : > { %4737 = vmatpush3.msra.mxu0 %v3932_v41 }
 0xc87   : > { %4738 = vmatprep.subr.mxu0 %v5200_v2 }
 0xc88   : > { %4739 = vmatpush3.msra.mxu0 %v3931_v3 }
 0xc89   : > { %4740 = vmatprep.subr.mxu0 %v5200_v2 }
 0xc8a   : > { %4741 = vmatpush3.msra.mxu0 %v3930_v4 }
 0xd3b   : > { %v3818_v36 = vpop.f32.mrf.mxu0 }
 0xd3c   : > { %v3822_v43 = vadd.f32 %v3818_v36, %v5907_v38  ;;  %v3853_v38 = vld [vmem:[%s5641_s4 + $0x8] sm:$0xff]  ;;  %s6348_s4 = scalar_lea.vmem %s6347_s27, %s5583_s30 }
 0xd3d   : > { %v4714_v44 = vpop.f32.mrf.mxu0  ;;  %4720 = vmatpush3.msra.mxu1 %v3853_v38  ;;  %v4491_v59 = vld [vmem:[%s6348_s4] ss:$0 sm:$0xff] }
 0xd3e   : > { %v3825_v45 = vsel %vm931_vm2, %v3822_v43, 0.0  ;;  %4721 = vmatprep.subr.mxu1 %v5200_v2 }
 0xd3f   : > { %3826 = vadd.xlane.f32.xlu1 %v3825_v45  ;;  %4722 = vmatpush3.msra.mxu1 %v3852_v53 }
 0xdc8   : > { %v3827_v46 = vpop.xlane.xlu1 %3826 }
 0xdc9   : > { %v3828_v47 = vmul.f32 0.03125, %v3827_v46 }
 0xdcb   : > { %v3829_v48 = vsub.f32 %v3822_v43, %v3828_v47 }
 0xdcd   : > { %v3830_v49 = vmul.f32 %v3829_v48, %v3829_v48 }
 0xdcf   : > { %v3831_v50 = vsel %vm931_vm2, %v3830_v49, 0.0 }
 0xdd0   : > { %3832 = vadd.xlane.f32.xlu0 %v3831_v50 }
 0xe59   : > { %v3833_v39 = vpop.xlane.xlu0 %3832 }
 0xe5a   : > { %v3834_v14 = vmul.f32 0.03125, %v3833_v39 }
 0xe5c   : > { %v3835_v16 = vadd.f32 1e-05, %v3834_v14 }
 0xe5e   : > { %4915 = vrsqrt.f32 %v3835_v16 }
 0xe6b   : > { %v4916_v58 = vpop.eup %4915 }
 0xe6c   : > { %v3837_v60 = vmul.f32 %v4916_v58, %v3829_v48 }
 0xe6e   : > { %v3844_v62 = vmul.f32 %v4491_v59, %v3837_v60 }
 0xe70   : > { %v3851_v63 = vadd.f32 %v4492_v61, %v3844_v62 }
 0xe72   : > { %4724 = vmatmul.mubr.msk.f32.vlgmr.msra.gmra.mxu1 %vm931_vm2, %v3851_v63 }
 0xf32   : > { %v3925_v5 = vpop.f32.mrf.mxu1 }
 0xf33   : > { %v3929_v9 = vmax.f32 %v3925_v5, 0.0 }
 0xf34   : > { %v4725_v7 = vpop.f32.mrf.mxu1 }
 0xf35   : > { %4743 = vmatmul.mubr.msk.f32.vlgmr.msra.gmra.mxu0 %vm3938_vm7, %v3929_v9 }
 0xff5   : > { %v4008_v13 = vpop.f32.mrf.mxu0 }
 0xff6   : > { %v4012_v15 = vadd.f32 %v4008_v13, %v3851_v63 }
 0xff7   : > { %v4744_v17 = vpop.f32.mrf.mxu0 }
 0xff8   : > { %v4015_v18 = vsel %vm931_vm2, %v4012_v15, 0.0 }
 0xff9   : > { %4016 = vadd.xlane.f32.xlu0 %v4015_v18 }
0x1082   : > { %v4017_v19 = vpop.xlane.xlu0 %4016 }
0x1083   : > { %v4018_v6 = vmul.f32 0.03125, %v4017_v19 }
0x1085   : > { %v4019_v20 = vsub.f32 %v4012_v15, %v4018_v6 }
0x1087   : > { %v4020_v22 = vmul.f32 %v4019_v20, %v4019_v20 }
0x1089   : > { %v4021_v2 = vsel %vm931_vm2, %v4020_v22, 0.0 }
0x108a   : > { %4022 = vadd.xlane.f32.xlu1 %v4021_v2 }
0x1113   : > { %v4023_v23 = vpop.xlane.xlu1 %4022 }
0x1114   : > { %v4024_v24 = vmul.f32 0.03125, %v4023_v23 }
0x1116   : > { %v4025_v25 = vadd.f32 1e-05, %v4024_v24 }
0x1118   : > { %4917 = vrsqrt.f32 %v4025_v25 }
0x1125   : > { %v4918_v26 = vpop.eup %4917 }
0x1126   : > { %v4027_v28 = vmul.f32 %v4918_v26, %v4019_v20 }
0x1128   : > { %v4034_v21 = vmul.f32 %v4495_v27, %v4027_v28  ;;  %4046 = sbr.rel (%p4497_p5) target bundleno = 4402 (0x1132), region = 108 }
0x112a   : > { %v4041_v32 = vadd.f32 %v4496_v31, %v4034_v21 }
0x112c   : > { %4042 = vst.msk [vmem:[#allocation2] sm:$0xff] %vm931_vm2, %v4041_v32 }
0x112d   : > { %4048 = vst.msk [vmem:[%s5634_s22] sm:$0xff] %vm1447_vm3, %v5802_v0  ;;  %4052 = vst.msk [vmem:[%s5639_s17] sm:$0xff] %vm1447_vm3, %v6024_v34 }
0x112e   : > { %4047 = vst.msk [vmem:[%s853_s1] sm:$0xff] %vm931_vm2, %v4041_v32 }
0x112f   : > { %4049 = vst.msk [vmem:[%s5634_s22 + $0x8] sm:$0xff] %vm1447_vm3, %v5804_v1  ;;  %4053 = vst.msk [vmem:[%s5639_s17 + $0x8] sm:$0xff] %vm1447_vm3, %v6026_v35 }
0x1130   : > { %4050 = vst.msk [vmem:[%s5634_s22 + $0x10] sm:$0xff] %vm1447_vm3, %v5813_v8  ;;  %4054 = vst.msk [vmem:[%s5639_s17 + $0x10] sm:$0xff] %vm1447_vm3, %v6035_v10 }
0x1131   : > { %4051 = vst.msk [vmem:[%s5634_s22 + $0x18] sm:$0xff] %vm1447_vm3, %v5816_v12  ;;  %4055 = vst.msk [vmem:[%s5639_s17 + $0x18] sm:$0xff] %vm1447_vm3, %v6038_v37 }
0x1132 PF: > { %s6353_s30 = sld [smem:[#allocation24_spill]]  ;;  %s4080_s5 = sshll.u32 %s853_s1, 4  ;;  %s4081_s5 = int_to_ptr.vmem [resolvable:$true] %s4080_s5 }
0x1133   : > { %s6354_s10 = sld [smem:[#allocation35_spill]]  ;;  %s5059_s19 = scalar_lea.vmem %s4081_s5, 128 }
0x1134   : > { %s6356_s9 = sld [smem:[#allocation53_spill]]  ;;  %p5060_p9 = scmp.ne.s32.totalorder %s4081_s5, %s5059_s19 }
0x1135   : > { %s5212_s17 = smov [#allocation12]  }
0x1136   : > { %p5061_p11 = pnand %p5060_p9, %p5426_p8  ;;  %s5063_s22 = sshll.u32 %s5212_s17, 4  ;;  %s5064_s22 = int_to_ptr.vmem [resolvable:$false] %s5063_s22 }
0x1137   : > { %s5065_s2 = scalar_lea.vmem %s5064_s22, 256  ;;  %p5066_p3 = scmp.lt.s32.totalorder %s4081_s5, %s5064_s22 }
0x1138   : > { %s4499_s20 = sshll.u32 %s6353_s30, 7  ;;  %p5062_p2 = pneg %p5061_p11 }
0x1139   : > { %s4057_s26 = scalar_lea.sflag [#allocation5], %s6354_s10  ;;  %p5067_p4 = scmp.lt.s32.totalorder %s5065_s2, %s5059_s19 }
0x113a   : > { %s4078_s0 = scalar_lea.hbm %s6356_s9, %s4499_s20 }
0x113b   : > { %p5068_p12 = por %p5067_p4, %p5066_p3 }
0x113d   : > { %p5069_p0 = pnand %p5068_p12, %p5062_p2 }
0x113f   : > { %5072 = shalt.err (!%p5069_p0)
}
0x1140   : > { %s5073_s29 = scalar_lea.hbm %s4078_s0, 128  ;;  %s5077_s6 = scalar_lea.hbm %s6356_s9, 256 }
0x1141   : > { %p5074_p10 = scmp.ne.s32.totalorder %s4078_s0, %s5073_s29  ;;  %p5078_p1 = scmp.lt.s32.totalorder %s4078_s0, %s6356_s9 }
0x1142   : > { %p5079_p13 = scmp.lt.s32.totalorder %s5077_s6, %s5073_s29 }
0x1143   : > { %p5075_p6 = pnand %p5074_p10, %p5426_p8 }
0x1144   : > { %p5080_p5 = por %p5079_p13, %p5078_p1 }
0x1145   : > { %p5076_p7 = pneg %p5075_p6 }
0x1147   : > { %p5081_p9 = pnand %p5080_p5, %p5076_p7 }
0x1149   : > { %5084 = shalt.err (!%p5081_p9)
}
0x114a   : > { %4755 = dma.vmem_to_hbm [thread:$0]  (%p5426_p8), %s4081_s5, 128, %s4078_s0, %s4057_s26  }
0x114b PF: > { %s6357_s4 = sld [smem:[#allocation27_spill]] }
0x114c   : > { %s6358_s23 = sld [smem:[#allocation20_spill]] }
0x114d   : > { %s6359_s8 = sld [smem:[#allocation34_spill]] }
0x1151   : > { %p4778_p11 = scmp.ge.s32.totalorder %s6357_s4, 2 }
0x1152   : > { %s4100_s25 = sand.u32 1, %s6358_s23  }
0x1153   : > { %p6360_p2 = scmp.ne.s32.totalorder %s6359_s8, 0  ;;  %s4101_s12 = scalar_lea.sflag [#allocation5], %s4100_s25 }
0x1155   : > { %p4774_p3 = pnand %p4778_p11, %p6360_p2 }
0x1157   : > { %p4775_p4 = pneg %p4774_p3 }
0x1159   : > { %5146 = dma.done.wait (%p4775_p4), %s4101_s12, 128  }
0x115a   : > { %5148 = vsyncadd (%p4775_p4), %s4101_s12, 4294967168  ;;  %s40_s1 = sadd.s32 1, %s6357_s4   ;;  %s6361_s24 = sld [smem:[#allocation18_spill]] }
0x115b   : > { %p37_p12 = scmp.ge.s32.totalorder %s40_s1, 6   ;;  %s6362_s25 = sld [smem:[#allocation19_spill]] }
0x115c   : > { %s6363_s26 = sld [smem:[#allocation30_spill]] }
0x115d   : > { %s6364_s27 = sld [smem:[#allocation21_spill]] }
0x115e   : > { %s6365_s28 = sld [smem:[#allocation22_spill]] }
0x115f   : > { %s6366_s29 = sld [smem:[#allocation31_spill]]  ;;  %39 = sbr.rel (!%p37_p12) target bundleno = 32 (0x20), region = 235 }
0x1160   : > { %s6367_s0 = sld [smem:[#allocation25_spill]] }
0x1161   : > { %s6368_s30 = sld [smem:[#allocation26_spill]] }
0x1162   : > { %s6369_s18 = sld [smem:[#allocation28_spill]] }
0x1163   : > { %s6370_s19 = sld [smem:[#allocation29_spill]] }
0x1164   :  { %4122 = vsyncpa [#allocation4], 1 }
0x1165   :  { %4124 = vsyncpa [#allocation4 + $0x1], 1 }
0x1166   :  { %4125 = vsyncpa [#allocation7], 1 }
0x1167   :  { %4127 = vsyncpa [#allocation7 + $0x1], 1 }
0x1168   :  { %4128 = vsyncpa [#allocation10], 1 }
0x1169   :  { %4130 = vsyncpa [#allocation10 + $0x1], 1 }
0x116a   :  { %4131 = vsyncpa [#allocation5], 1 }
0x116b   :  { %4133 = vsyncpa [#allocation5 + $0x1], 1 }

</bundles_post_ra>
